<compile_context>
chip_gen: v6e
topology: v6e:2x2x1
jax: 0.10.0
libtpu: 0.0.40
codegen_flags: <defaults>
</compile_context>

<pallas_src>
import functools

import jax
import jax.numpy as jnp
from jax import lax
from jax.experimental import pallas as pl
from jax.experimental.pallas import tpu as pltpu


# ---------------------------------------------------------------------------
# Fused kernel: one transformer encoder layer per grid step, activation resident
# in the output block across the layer axis.  grid = (batch, layer).
# ---------------------------------------------------------------------------
def encoder_layer_kernel(x0_ref,
                         wqkv_ref, bqkv_ref, wo_ref, bo_ref,
                         n1w_ref, n1b_ref, w1_ref, b1_ref,
                         w2_ref, b2_ref, n2w_ref, n2b_ref,
                         o_ref,
                         *, embed, num_heads, eps):
    layer = pl.program_id(1)
    dh = embed // num_heads

    # Layer 0: seed the resident activation (output block) with the patch embedding.
    @pl.when(layer == 0)
    def _():
        o_ref[...] = x0_ref[...]

    x = o_ref[0]                                     # (S, E) fp32, resident in VMEM
    xb = x.astype(jnp.bfloat16)

    # ---- fused QKV projection (1/sqrt(dh) pre-folded into the q columns) ----------
    qkv = (jnp.dot(xb, wqkv_ref[0], preferred_element_type=jnp.float32)
           + bqkv_ref[0])                            # (S, 3E) fp32
    qkvb = qkv.astype(jnp.bfloat16)

    # ---- multi-head self-attention -------------------------------------------------
    # Per-head score/softmax/context (dh=32 sub-tile slices are static), then a single
    # lane-concat and ONE full-depth output projection (no per-head K=32 matmuls).
    ctx_heads = []
    for h in range(num_heads):
        q_h = qkvb[:, h * dh:(h + 1) * dh]                               # (S, dh)
        k_h = qkvb[:, embed + h * dh:embed + (h + 1) * dh]               # (S, dh)
        v_h = qkvb[:, 2 * embed + h * dh:2 * embed + (h + 1) * dh]       # (S, dh)
        # q @ k^T without materializing a transpose (contract last dims).
        s = lax.dot_general(q_h, k_h, (((1,), (1,)), ((), ())),
                            preferred_element_type=jnp.float32)          # (S, S)
        m = jnp.max(s, axis=-1, keepdims=True)
        p = jnp.exp(s - m)
        p = p * pl.reciprocal(jnp.sum(p, axis=-1, keepdims=True), approx=True)
        ctx_heads.append(jnp.dot(p.astype(jnp.bfloat16), v_h,
                                 preferred_element_type=jnp.float32))    # (S, dh)
    ctx = jnp.concatenate(ctx_heads, axis=-1).astype(jnp.bfloat16)       # (S, E)
    attn = (jnp.dot(ctx, wo_ref[0], preferred_element_type=jnp.float32)
            + bo_ref[0])                                                 # (S, E)

    # ---- residual + LayerNorm 1 (two-pass variance) --------------------------------
    x = x + attn
    mu = jnp.mean(x, axis=-1, keepdims=True)
    xc = x - mu
    var = jnp.mean(xc * xc, axis=-1, keepdims=True)
    x = xc * lax.rsqrt(var + eps) * n1w_ref[0] + n1b_ref[0]

    # ---- feed-forward (ReLU) --------------------------------------------------------
    h1 = (jnp.dot(x.astype(jnp.bfloat16), w1_ref[0],
                  preferred_element_type=jnp.float32) + b1_ref[0])
    h1 = jnp.maximum(h1, 0.0)
    ff = (jnp.dot(h1.astype(jnp.bfloat16), w2_ref[0],
                  preferred_element_type=jnp.float32) + b2_ref[0])

    # ---- residual + LayerNorm 2 -----------------------------------------------------
    x = x + ff
    mu = jnp.mean(x, axis=-1, keepdims=True)
    xc = x - mu
    var = jnp.mean(xc * xc, axis=-1, keepdims=True)
    x = xc * lax.rsqrt(var + eps) * n2w_ref[0] + n2b_ref[0]

    # Single store per layer; HBM writeback only happens when the batch index changes.
    o_ref[0] = x


# ---------------------------------------------------------------------------
# Wrapper: patch embedding in XLA, weight stacking / bf16 cast, one pallas_call
# ---------------------------------------------------------------------------
def patch_transformer_forward(x, conv_w, conv_b, pos, layers, patch_size,
                              num_heads, eps=1e-5):
    N, C, H, W = x.shape
    p = patch_size
    E = conv_w.shape[0]
    Hp, Wp = H // p, W // p
    S = Hp * Wp
    CPP = C * p * p
    L = len(layers)
    F = layers[0]["w1"].shape[1]
    dh = E // num_heads
    scale = 1.0 / (dh ** 0.5)

    # --- patch embedding + positional add in plain XLA (one-time, kept out of the
    #     fused kernel so its operands are not VMEM-resident for every layer step) ---
    patches = (x.reshape(N, C, Hp, p, Wp, p)
                 .transpose(0, 2, 4, 1, 3, 5)
                 .reshape(N, S, CPP))                       # sequence order == flatten(2)
    wemb = conv_w.reshape(E, CPP).T                         # (CPP, E)
    x0 = (jnp.einsum('nsc,ce->nse', patches, wemb,
                     preferred_element_type=jnp.float32)
          + (pos[:S] + conv_b[None, :])[None, :, :])        # (N, S, E) fp32

    # --- stack per-layer params on a leading L axis ----------------------------------
    def stack(name, dtype=jnp.float32):
        return jnp.stack([lp[name] for lp in layers]).astype(dtype)

    # Fold 1/sqrt(dh) into the q columns of the QKV projection (weights AND bias).
    qkv_scale = jnp.concatenate([jnp.full((E,), scale, jnp.float32),
                                 jnp.ones((2 * E,), jnp.float32)])
    wqkv = (stack("wqkv") * qkv_scale[None, None, :]).astype(jnp.bfloat16)  # (L, E, 3E)
    bqkv = stack("bqkv") * qkv_scale[None, None, :]                         # (L, 1, 3E)
    wo = stack("wo", jnp.bfloat16)                                          # (L, E, E)
    bo = stack("bo")
    n1w, n1b = stack("n1w"), stack("n1b")
    w1, b1 = stack("w1", jnp.bfloat16), stack("b1")                         # (L, E, F)
    w2, b2 = stack("w2", jnp.bfloat16), stack("b2")                         # (L, F, E)
    n2w, n2b = stack("n2w"), stack("n2b")

    kern = functools.partial(encoder_layer_kernel,
                             embed=E, num_heads=num_heads, eps=eps)

    def per_layer(shape):   # per-layer weights: re-fetched when the layer index moves
        return pl.BlockSpec((1,) + shape, lambda b, l: (l, 0, 0))

    def per_batch(shape):   # per-image blocks: constant across the layer axis
        return pl.BlockSpec((1,) + shape, lambda b, l: (b, 0, 0))

    # --- explicit VMEM budget (review: re-derive for v7x's 64 MiB physical) ----------
    w_bytes = 2 * (E * 3 * E + E * E + E * F + F * E)       # bf16 weights / layer
    b_bytes = 4 * (3 * E + 6 * E + F)                       # fp32 biases + LN rows
    act_bytes = 4 * S * E                                   # one activation block
    per_step = 2 * (w_bytes + b_bytes + act_bytes) + 2 * act_bytes   # dbl-buffered
    vmem_limit = int(max(32 * 2**20, min(64 * 2**20, 4 * per_step)))

    out = pl.pallas_call(
        kern,
        out_shape=jax.ShapeDtypeStruct((N, S, E), jnp.float32),
        grid=(N, L),
        in_specs=[per_batch((S, E)),
                  per_layer((E, 3 * E)), per_layer((1, 3 * E)),
                  per_layer((E, E)), per_layer((1, E)),
                  per_layer((1, E)), per_layer((1, E)),
                  per_layer((E, F)), per_layer((1, F)),
                  per_layer((F, E)), per_layer((1, E)),
                  per_layer((1, E)), per_layer((1, E))],
        out_specs=per_batch((S, E)),
        compiler_params=pltpu.CompilerParams(
            dimension_semantics=("parallel", "arbitrary"),
            vmem_limit_bytes=vmem_limit),
    )(x0, wqkv, bqkv, wo, bo, n1w, n1b, w1, b1, w2, b2, n2w, n2b)

    # (N, S, E) -> (S, N, E) to match PyTorch (batch_first=False) output
    return out.transpose(1, 0, 2)


# ---------------------------------------------------------------------------
# Deterministic parameter init (synthetic; shapes from __init__)
# ---------------------------------------------------------------------------
def init_params(key, in_channels, patch_size, E, F, num_layers):
    keys = jax.random.split(key, 3 + num_layers)
    conv_w = jax.random.normal(keys[0], (E, in_channels, patch_size, patch_size),
                               jnp.float32) * 0.02
    conv_b = jax.random.normal(keys[1], (E,), jnp.float32) * 0.02
    pos = jax.random.uniform(keys[2], (500, E), jnp.float32)   # torch.rand(500, E)
    layers = []
    for i in range(num_layers):
        lk = jax.random.split(keys[3 + i], 4)
        layers.append(dict(
            # linear weights stored pre-transposed to (in, out) so kernel does x @ W + b
            wqkv=jax.random.normal(lk[0], (E, 3 * E), jnp.float32) * 0.02,
            bqkv=jnp.zeros((1, 3 * E), jnp.float32),
            wo=jax.random.normal(lk[1], (E, E), jnp.float32) * 0.02,
            bo=jnp.zeros((1, E), jnp.float32),
            n1w=jnp.ones((1, E), jnp.float32),
            n1b=jnp.zeros((1, E), jnp.float32),
            w1=jax.random.normal(lk[2], (E, F), jnp.float32) * 0.02,
            b1=jnp.zeros((1, F), jnp.float32),
            w2=jax.random.normal(lk[3], (F, E), jnp.float32) * 0.02,
            b2=jnp.zeros((1, E), jnp.float32),
            n2w=jnp.ones((1, E), jnp.float32),
            n2b=jnp.zeros((1, E), jnp.float32),
        ))
    return conv_w, conv_b, pos, layers


if __name__ == "__main__":
    # Small shapes consistent with the module:
    #   x: (N=2, C=4, H=16, W=16), patch_size=4 -> S = (16/4)*(16/4) = 16 patches
    #   embedding_dims=128 (module default), num_heads=4, feedforward=256, layers=4
    N, C, H, W = 2, 4, 16, 16
    PATCH = 4
    E, HEADS, FF, LAYERS = 128, 4, 256, 4

    key = jax.random.PRNGKey(0)
    kx, kp = jax.random.split(key)
    x = jax.random.normal(kx, (N, C, H, W), jnp.float32)
    conv_w, conv_b, pos, layers = init_params(kp, C, PATCH, E, FF, LAYERS)

    out = patch_transformer_forward(x, conv_w, conv_b, pos, layers, PATCH, HEADS)
    out = jax.block_until_ready(out)
    assert out.shape == ((H // PATCH) * (W // PATCH), N, E), out.shape
    print("KERNEL_OK")
</pallas_src>

<mosaic_0001>
module attributes {stable_mosaic.version = 11 : i64} {
  func.func @encoder_layer_kernel(%arg0: i32, %arg1: i32, %arg2: memref<1x16x128xf32, #tpu.memory_space<vmem>>, %arg3: memref<1x128x384xbf16, #tpu.memory_space<vmem>>, %arg4: memref<1x1x384xf32, #tpu.memory_space<vmem>>, %arg5: memref<1x128x128xbf16, #tpu.memory_space<vmem>>, %arg6: memref<1x1x128xf32, #tpu.memory_space<vmem>>, %arg7: memref<1x1x128xf32, #tpu.memory_space<vmem>>, %arg8: memref<1x1x128xf32, #tpu.memory_space<vmem>>, %arg9: memref<1x128x256xbf16, #tpu.memory_space<vmem>>, %arg10: memref<1x1x256xf32, #tpu.memory_space<vmem>>, %arg11: memref<1x256x128xbf16, #tpu.memory_space<vmem>>, %arg12: memref<1x1x128xf32, #tpu.memory_space<vmem>>, %arg13: memref<1x1x128xf32, #tpu.memory_space<vmem>>, %arg14: memref<1x1x128xf32, #tpu.memory_space<vmem>>, %arg15: memref<1x16x128xf32, #tpu.memory_space<vmem>>) attributes {dimension_semantics = [#tpu.dimension_semantics<parallel>, #tpu.dimension_semantics<arbitrary>], iteration_bounds = array<i64: 2, 4>, scalar_prefetch = 0 : i64, scratch_operands = 0 : i64, tpu.core_type = #tpu.core_type<tc>, window_params = [{transform_indices = @transform_0, window_bounds = array<i64: 1, 16, 128>}, {transform_indices = @transform_1, window_bounds = array<i64: 1, 128, 384>}, {transform_indices = @transform_2, window_bounds = array<i64: 1, 1, 384>}, {transform_indices = @transform_3, window_bounds = array<i64: 1, 128, 128>}, {transform_indices = @transform_4, window_bounds = array<i64: 1, 1, 128>}, {transform_indices = @transform_5, window_bounds = array<i64: 1, 1, 128>}, {transform_indices = @transform_6, window_bounds = array<i64: 1, 1, 128>}, {transform_indices = @transform_7, window_bounds = array<i64: 1, 128, 256>}, {transform_indices = @transform_8, window_bounds = array<i64: 1, 1, 256>}, {transform_indices = @transform_9, window_bounds = array<i64: 1, 256, 128>}, {transform_indices = @transform_10, window_bounds = array<i64: 1, 1, 128>}, {transform_indices = @transform_11, window_bounds = array<i64: 1, 1, 128>}, {transform_indices = @transform_12, window_bounds = array<i64: 1, 1, 128>}, {transform_indices = @transform_13, window_bounds = array<i64: 1, 16, 128>}]} {
    %c0_i32 = arith.constant 0 : i32
    %0 = arith.cmpi eq, %arg1, %c0_i32 : i32
    %1 = arith.extui %0 : i1 to i32
    %c0_i32_0 = arith.constant 0 : i32
    %2 = arith.cmpi ne, %1, %c0_i32_0 : i32
    scf.if %2 {
      %c0_72 = arith.constant 0 : index
      %c0_73 = arith.constant 0 : index
      %c0_74 = arith.constant 0 : index
      %158 = vector.load %arg2[%c0_72, %c0_73, %c0_74] : memref<1x16x128xf32, #tpu.memory_space<vmem>>, vector<1x16x128xf32>
      %c0_75 = arith.constant 0 : index
      %c0_76 = arith.constant 0 : index
      %c0_77 = arith.constant 0 : index
      %159 = vector.load %arg15[%c0_75, %c0_76, %c0_77] : memref<1x16x128xf32, #tpu.memory_space<vmem>>, vector<1x16x128xf32>
      tpu.vector_store %arg15[%c0_75, %c0_76, %c0_77], %158 {strides = array<i32>} : memref<1x16x128xf32, #tpu.memory_space<vmem>>, vector<1x16x128xf32>,
    } else {
    }
    %c0 = arith.constant 0 : index
    %c0_1 = arith.constant 0 : index
    %c0_2 = arith.constant 0 : index
    %3 = vector.load %arg15[%c0, %c0_1, %c0_2] : memref<1x16x128xf32, #tpu.memory_space<vmem>>, vector<1x16x128xf32>
    %4 = vector.shape_cast %3 : vector<1x16x128xf32> to vector<16x128xf32>
    %5 = arith.truncf %4 : vector<16x128xf32> to vector<16x128xbf16>
    %c0_3 = arith.constant 0 : index
    %c0_4 = arith.constant 0 : index
    %c0_5 = arith.constant 0 : index
    %6 = vector.load %arg3[%c0_3, %c0_4, %c0_5] : memref<1x128x384xbf16, #tpu.memory_space<vmem>>, vector<1x128x384xbf16>
    %7 = vector.shape_cast %6 : vector<1x128x384xbf16> to vector<128x384xbf16>
    %cst = arith.constant dense<0.000000e+00> : vector<16x384xf32>
    %8 = tpu.matmul %5, %7, %cst {dimension_numbers = #tpu.dot_dimension_numbers<[1], [0], [0], [1], [0, 0, 1, 1], [], []>} : vector<16x128xbf16>, vector<128x384xbf16>, vector<16x384xf32> -> vector<16x384xf32>
    %c0_6 = arith.constant 0 : index
    %c0_7 = arith.constant 0 : index
    %c0_8 = arith.constant 0 : index
    %9 = vector.load %arg4[%c0_6, %c0_7, %c0_8] : memref<1x1x384xf32, #tpu.memory_space<vmem>>, vector<1x1x384xf32>
    %10 = vector.shape_cast %9 : vector<1x1x384xf32> to vector<1x384xf32>
    %11 = vector.broadcast %10 : vector<1x384xf32> to vector<16x384xf32>
    %12 = arith.addf %8, %11 : vector<16x384xf32>
    %13 = arith.truncf %12 : vector<16x384xf32> to vector<16x384xbf16>
    %14 = vector.extract_strided_slice %13 {offsets = [0, 0], sizes = [16, 32], strides = [1, 1]} : vector<16x384xbf16> to vector<16x32xbf16>
    %15 = vector.extract_strided_slice %13 {offsets = [0, 128], sizes = [16, 32], strides = [1, 1]} : vector<16x384xbf16> to vector<16x32xbf16>
    %16 = vector.extract_strided_slice %13 {offsets = [0, 256], sizes = [16, 32], strides = [1, 1]} : vector<16x384xbf16> to vector<16x32xbf16>
    %cst_9 = arith.constant dense<0.000000e+00> : vector<16x16xf32>
    %17 = tpu.matmul %14, %15, %cst_9 {dimension_numbers = #tpu.dot_dimension_numbers<[1], [1], [0], [0], [0, 0, 1, 0], [], []>} : vector<16x32xbf16>, vector<16x32xbf16>, vector<16x16xf32> -> vector<16x16xf32>
    %cst_10 = arith.constant dense<0xFF800000> : vector<16xf32>
    %18 = vector.multi_reduction <maximumf>, %17, %cst_10 [1] : vector<16x16xf32> to vector<16xf32>
    %19 = vector.shape_cast %18 : vector<16xf32> to vector<16x1xf32>
    %20 = vector.broadcast %19 : vector<16x1xf32> to vector<16x16xf32>
    %21 = arith.subf %17, %20 : vector<16x16xf32>
    %22 = math.exp %21 : vector<16x16xf32>
    %cst_11 = arith.constant dense<0.000000e+00> : vector<16xf32>
    %23 = vector.multi_reduction <add>, %22, %cst_11 [1] : vector<16x16xf32> to vector<16xf32>
    %24 = vector.shape_cast %23 : vector<16xf32> to vector<16x1xf32>
    %25 = tpu.reciprocal %24 {approx = true} : vector<16x1xf32> -> vector<16x1xf32>
    %26 = vector.broadcast %25 : vector<16x1xf32> to vector<16x16xf32>
    %27 = arith.mulf %22, %26 : vector<16x16xf32>
    %28 = arith.truncf %27 : vector<16x16xf32> to vector<16x16xbf16>
    %cst_12 = arith.constant dense<0.000000e+00> : vector<16x32xf32>
    %29 = tpu.matmul %28, %16, %cst_12 {dimension_numbers = #tpu.dot_dimension_numbers<[1], [0], [0], [1], [0, 0, 1, 1], [], []>} : vector<16x16xbf16>, vector<16x32xbf16>, vector<16x32xf32> -> vector<16x32xf32>
    %30 = vector.extract_strided_slice %13 {offsets = [0, 32], sizes = [16, 32], strides = [1, 1]} : vector<16x384xbf16> to vector<16x32xbf16>
    %31 = vector.extract_strided_slice %13 {offsets = [0, 160], sizes = [16, 32], strides = [1, 1]} : vector<16x384xbf16> to vector<16x32xbf16>
    %32 = vector.extract_strided_slice %13 {offsets = [0, 288], sizes = [16, 32], strides = [1, 1]} : vector<16x384xbf16> to vector<16x32xbf16>
    %cst_13 = arith.constant dense<0.000000e+00> : vector<16x16xf32>
    %33 = tpu.matmul %30, %31, %cst_13 {dimension_numbers = #tpu.dot_dimension_numbers<[1], [1], [0], [0], [0, 0, 1, 0], [], []>} : vector<16x32xbf16>, vector<16x32xbf16>, vector<16x16xf32> -> vector<16x16xf32>
    %cst_14 = arith.constant dense<0xFF800000> : vector<16xf32>
    %34 = vector.multi_reduction <maximumf>, %33, %cst_14 [1] : vector<16x16xf32> to vector<16xf32>
    %35 = vector.shape_cast %34 : vector<16xf32> to vector<16x1xf32>
    %36 = vector.broadcast %35 : vector<16x1xf32> to vector<16x16xf32>
    %37 = arith.subf %33, %36 : vector<16x16xf32>
    %38 = math.exp %37 : vector<16x16xf32>
    %cst_15 = arith.constant dense<0.000000e+00> : vector<16xf32>
    %39 = vector.multi_reduction <add>, %38, %cst_15 [1] : vector<16x16xf32> to vector<16xf32>
    %40 = vector.shape_cast %39 : vector<16xf32> to vector<16x1xf32>
    %41 = tpu.reciprocal %40 {approx = true} : vector<16x1xf32> -> vector<16x1xf32>
    %42 = vector.broadcast %41 : vector<16x1xf32> to vector<16x16xf32>
    %43 = arith.mulf %38, %42 : vector<16x16xf32>
    %44 = arith.truncf %43 : vector<16x16xf32> to vector<16x16xbf16>
    %cst_16 = arith.constant dense<0.000000e+00> : vector<16x32xf32>
    %45 = tpu.matmul %44, %32, %cst_16 {dimension_numbers = #tpu.dot_dimension_numbers<[1], [0], [0], [1], [0, 0, 1, 1], [], []>} : vector<16x16xbf16>, vector<16x32xbf16>, vector<16x32xf32> -> vector<16x32xf32>
    %46 = vector.extract_strided_slice %13 {offsets = [0, 64], sizes = [16, 32], strides = [1, 1]} : vector<16x384xbf16> to vector<16x32xbf16>
    %47 = vector.extract_strided_slice %13 {offsets = [0, 192], sizes = [16, 32], strides = [1, 1]} : vector<16x384xbf16> to vector<16x32xbf16>
    %48 = vector.extract_strided_slice %13 {offsets = [0, 320], sizes = [16, 32], strides = [1, 1]} : vector<16x384xbf16> to vector<16x32xbf16>
    %cst_17 = arith.constant dense<0.000000e+00> : vector<16x16xf32>
    %49 = tpu.matmul %46, %47, %cst_17 {dimension_numbers = #tpu.dot_dimension_numbers<[1], [1], [0], [0], [0, 0, 1, 0], [], []>} : vector<16x32xbf16>, vector<16x32xbf16>, vector<16x16xf32> -> vector<16x16xf32>
    %cst_18 = arith.constant dense<0xFF800000> : vector<16xf32>
    %50 = vector.multi_reduction <maximumf>, %49, %cst_18 [1] : vector<16x16xf32> to vector<16xf32>
    %51 = vector.shape_cast %50 : vector<16xf32> to vector<16x1xf32>
    %52 = vector.broadcast %51 : vector<16x1xf32> to vector<16x16xf32>
    %53 = arith.subf %49, %52 : vector<16x16xf32>
    %54 = math.exp %53 : vector<16x16xf32>
    %cst_19 = arith.constant dense<0.000000e+00> : vector<16xf32>
    %55 = vector.multi_reduction <add>, %54, %cst_19 [1] : vector<16x16xf32> to vector<16xf32>
    %56 = vector.shape_cast %55 : vector<16xf32> to vector<16x1xf32>
    %57 = tpu.reciprocal %56 {approx = true} : vector<16x1xf32> -> vector<16x1xf32>
    %58 = vector.broadcast %57 : vector<16x1xf32> to vector<16x16xf32>
    %59 = arith.mulf %54, %58 : vector<16x16xf32>
    %60 = arith.truncf %59 : vector<16x16xf32> to vector<16x16xbf16>
    %cst_20 = arith.constant dense<0.000000e+00> : vector<16x32xf32>
    %61 = tpu.matmul %60, %48, %cst_20 {dimension_numbers = #tpu.dot_dimension_numbers<[1], [0], [0], [1], [0, 0, 1, 1], [], []>} : vector<16x16xbf16>, vector<16x32xbf16>, vector<16x32xf32> -> vector<16x32xf32>
    %62 = vector.extract_strided_slice %13 {offsets = [0, 96], sizes = [16, 32], strides = [1, 1]} : vector<16x384xbf16> to vector<16x32xbf16>
    %63 = vector.extract_strided_slice %13 {offsets = [0, 224], sizes = [16, 32], strides = [1, 1]} : vector<16x384xbf16> to vector<16x32xbf16>
    %64 = vector.extract_strided_slice %13 {offsets = [0, 352], sizes = [16, 32], strides = [1, 1]} : vector<16x384xbf16> to vector<16x32xbf16>
    %cst_21 = arith.constant dense<0.000000e+00> : vector<16x16xf32>
    %65 = tpu.matmul %62, %63, %cst_21 {dimension_numbers = #tpu.dot_dimension_numbers<[1], [1], [0], [0], [0, 0, 1, 0], [], []>} : vector<16x32xbf16>, vector<16x32xbf16>, vector<16x16xf32> -> vector<16x16xf32>
    %cst_22 = arith.constant dense<0xFF800000> : vector<16xf32>
    %66 = vector.multi_reduction <maximumf>, %65, %cst_22 [1] : vector<16x16xf32> to vector<16xf32>
    %67 = vector.shape_cast %66 : vector<16xf32> to vector<16x1xf32>
    %68 = vector.broadcast %67 : vector<16x1xf32> to vector<16x16xf32>
    %69 = arith.subf %65, %68 : vector<16x16xf32>
    %70 = math.exp %69 : vector<16x16xf32>
    %cst_23 = arith.constant dense<0.000000e+00> : vector<16xf32>
    %71 = vector.multi_reduction <add>, %70, %cst_23 [1] : vector<16x16xf32> to vector<16xf32>
    %72 = vector.shape_cast %71 : vector<16xf32> to vector<16x1xf32>
    %73 = tpu.reciprocal %72 {approx = true} : vector<16x1xf32> -> vector<16x1xf32>
    %74 = vector.broadcast %73 : vector<16x1xf32> to vector<16x16xf32>
    %75 = arith.mulf %70, %74 : vector<16x16xf32>
    %76 = arith.truncf %75 : vector<16x16xf32> to vector<16x16xbf16>
    %cst_24 = arith.constant dense<0.000000e+00> : vector<16x32xf32>
    %77 = tpu.matmul %76, %64, %cst_24 {dimension_numbers = #tpu.dot_dimension_numbers<[1], [0], [0], [1], [0, 0, 1, 1], [], []>} : vector<16x16xbf16>, vector<16x32xbf16>, vector<16x32xf32> -> vector<16x32xf32>
    %78 = tpu.concatenate %29, %45, %61, %77 in 1 : vector<16x32xf32>, vector<16x32xf32>, vector<16x32xf32>, vector<16x32xf32> -> vector<16x128xf32>
    %79 = arith.truncf %78 : vector<16x128xf32> to vector<16x128xbf16>
    %c0_25 = arith.constant 0 : index
    %c0_26 = arith.constant 0 : index
    %c0_27 = arith.constant 0 : index
    %80 = vector.load %arg5[%c0_25, %c0_26, %c0_27] : memref<1x128x128xbf16, #tpu.memory_space<vmem>>, vector<1x128x128xbf16>
    %81 = vector.shape_cast %80 : vector<1x128x128xbf16> to vector<128x128xbf16>
    %cst_28 = arith.constant dense<0.000000e+00> : vector<16x128xf32>
    %82 = tpu.matmul %79, %81, %cst_28 {dimension_numbers = #tpu.dot_dimension_numbers<[1], [0], [0], [1], [0, 0, 1, 1], [], []>} : vector<16x128xbf16>, vector<128x128xbf16>, vector<16x128xf32> -> vector<16x128xf32>
    %c0_29 = arith.constant 0 : index
    %c0_30 = arith.constant 0 : index
    %c0_31 = arith.constant 0 : index
    %83 = vector.load %arg6[%c0_29, %c0_30, %c0_31] : memref<1x1x128xf32, #tpu.memory_space<vmem>>, vector<1x1x128xf32>
    %84 = vector.shape_cast %83 : vector<1x1x128xf32> to vector<1x128xf32>
    %85 = vector.broadcast %84 : vector<1x128xf32> to vector<16x128xf32>
    %86 = arith.addf %82, %85 : vector<16x128xf32>
    %87 = arith.addf %4, %86 : vector<16x128xf32>
    %cst_32 = arith.constant dense<0.000000e+00> : vector<16xf32>
    %88 = vector.multi_reduction <add>, %87, %cst_32 [1] : vector<16x128xf32> to vector<16xf32>
    %89 = vector.shape_cast %88 : vector<16xf32> to vector<16x1xf32>
    %cst_33 = arith.constant 1.280000e+02 : f32
    %90 = vector.broadcast %cst_33 : f32 to vector<16x1xf32>
    %91 = arith.divf %89, %90 : vector<16x1xf32>
    %92 = vector.broadcast %91 : vector<16x1xf32> to vector<16x128xf32>
    %93 = arith.subf %87, %92 : vector<16x128xf32>
    %94 = arith.mulf %93, %93 : vector<16x128xf32>
    %cst_34 = arith.constant dense<0.000000e+00> : vector<16xf32>
    %95 = vector.multi_reduction <add>, %94, %cst_34 [1] : vector<16x128xf32> to vector<16xf32>
    %96 = vector.shape_cast %95 : vector<16xf32> to vector<16x1xf32>
    %cst_35 = arith.constant 1.280000e+02 : f32
    %97 = vector.broadcast %cst_35 : f32 to vector<16x1xf32>
    %98 = arith.divf %96, %97 : vector<16x1xf32>
    %cst_36 = arith.constant 9.99999974E-6 : f32
    %99 = vector.broadcast %cst_36 : f32 to vector<16x1xf32>
    %100 = arith.addf %98, %99 : vector<16x1xf32>
    %101 = math.rsqrt %100 : vector<16x1xf32>
    %102 = vector.broadcast %101 : vector<16x1xf32> to vector<16x128xf32>
    %103 = arith.mulf %93, %102 : vector<16x128xf32>
    %c0_37 = arith.constant 0 : index
    %c0_38 = arith.constant 0 : index
    %c0_39 = arith.constant 0 : index
    %104 = vector.load %arg7[%c0_37, %c0_38, %c0_39] : memref<1x1x128xf32, #tpu.memory_space<vmem>>, vector<1x1x128xf32>
    %105 = vector.shape_cast %104 : vector<1x1x128xf32> to vector<1x128xf32>
    %106 = vector.broadcast %105 : vector<1x128xf32> to vector<16x128xf32>
    %107 = arith.mulf %103, %106 : vector<16x128xf32>
    %c0_40 = arith.constant 0 : index
    %c0_41 = arith.constant 0 : index
    %c0_42 = arith.constant 0 : index
    %108 = vector.load %arg8[%c0_40, %c0_41, %c0_42] : memref<1x1x128xf32, #tpu.memory_space<vmem>>, vector<1x1x128xf32>
    %109 = vector.shape_cast %108 : vector<1x1x128xf32> to vector<1x128xf32>
    %110 = vector.broadcast %109 : vector<1x128xf32> to vector<16x128xf32>
    %111 = arith.addf %107, %110 : vector<16x128xf32>
    %112 = arith.truncf %111 : vector<16x128xf32> to vector<16x128xbf16>
    %c0_43 = arith.constant 0 : index
    %c0_44 = arith.constant 0 : index
    %c0_45 = arith.constant 0 : index
    %113 = vector.load %arg9[%c0_43, %c0_44, %c0_45] : memref<1x128x256xbf16, #tpu.memory_space<vmem>>, vector<1x128x256xbf16>
    %114 = vector.shape_cast %113 : vector<1x128x256xbf16> to vector<128x256xbf16>
    %cst_46 = arith.constant dense<0.000000e+00> : vector<16x256xf32>
    %115 = tpu.matmul %112, %114, %cst_46 {dimension_numbers = #tpu.dot_dimension_numbers<[1], [0], [0], [1], [0, 0, 1, 1], [], []>} : vector<16x128xbf16>, vector<128x256xbf16>, vector<16x256xf32> -> vector<16x256xf32>
    %c0_47 = arith.constant 0 : index
    %c0_48 = arith.constant 0 : index
    %c0_49 = arith.constant 0 : index
    %116 = vector.load %arg10[%c0_47, %c0_48, %c0_49] : memref<1x1x256xf32, #tpu.memory_space<vmem>>, vector<1x1x256xf32>
    %117 = vector.shape_cast %116 : vector<1x1x256xf32> to vector<1x256xf32>
    %118 = vector.broadcast %117 : vector<1x256xf32> to vector<16x256xf32>
    %119 = arith.addf %115, %118 : vector<16x256xf32>
    %cst_50 = arith.constant 0.000000e+00 : f32
    %120 = vector.broadcast %cst_50 : f32 to vector<16x256xf32>
    %121 = arith.maximumf %119, %120 : vector<16x256xf32>
    %122 = arith.truncf %121 : vector<16x256xf32> to vector<16x256xbf16>
    %c0_51 = arith.constant 0 : index
    %c0_52 = arith.constant 0 : index
    %c0_53 = arith.constant 0 : index
    %123 = vector.load %arg11[%c0_51, %c0_52, %c0_53] : memref<1x256x128xbf16, #tpu.memory_space<vmem>>, vector<1x256x128xbf16>
    %124 = vector.shape_cast %123 : vector<1x256x128xbf16> to vector<256x128xbf16>
    %cst_54 = arith.constant dense<0.000000e+00> : vector<16x128xf32>
    %125 = tpu.matmul %122, %124, %cst_54 {dimension_numbers = #tpu.dot_dimension_numbers<[1], [0], [0], [1], [0, 0, 1, 1], [], []>} : vector<16x256xbf16>, vector<256x128xbf16>, vector<16x128xf32> -> vector<16x128xf32>
    %c0_55 = arith.constant 0 : index
    %c0_56 = arith.constant 0 : index
    %c0_57 = arith.constant 0 : index
    %126 = vector.load %arg12[%c0_55, %c0_56, %c0_57] : memref<1x1x128xf32, #tpu.memory_space<vmem>>, vector<1x1x128xf32>
    %127 = vector.shape_cast %126 : vector<1x1x128xf32> to vector<1x128xf32>
    %128 = vector.broadcast %127 : vector<1x128xf32> to vector<16x128xf32>
    %129 = arith.addf %125, %128 : vector<16x128xf32>
    %130 = arith.addf %111, %129 : vector<16x128xf32>
    %cst_58 = arith.constant dense<0.000000e+00> : vector<16xf32>
    %131 = vector.multi_reduction <add>, %130, %cst_58 [1] : vector<16x128xf32> to vector<16xf32>
    %132 = vector.shape_cast %131 : vector<16xf32> to vector<16x1xf32>
    %cst_59 = arith.constant 1.280000e+02 : f32
    %133 = vector.broadcast %cst_59 : f32 to vector<16x1xf32>
    %134 = arith.divf %132, %133 : vector<16x1xf32>
    %135 = vector.broadcast %134 : vector<16x1xf32> to vector<16x128xf32>
    %136 = arith.subf %130, %135 : vector<16x128xf32>
    %137 = arith.mulf %136, %136 : vector<16x128xf32>
    %cst_60 = arith.constant dense<0.000000e+00> : vector<16xf32>
    %138 = vector.multi_reduction <add>, %137, %cst_60 [1] : vector<16x128xf32> to vector<16xf32>
    %139 = vector.shape_cast %138 : vector<16xf32> to vector<16x1xf32>
    %cst_61 = arith.constant 1.280000e+02 : f32
    %140 = vector.broadcast %cst_61 : f32 to vector<16x1xf32>
    %141 = arith.divf %139, %140 : vector<16x1xf32>
    %cst_62 = arith.constant 9.99999974E-6 : f32
    %142 = vector.broadcast %cst_62 : f32 to vector<16x1xf32>
    %143 = arith.addf %141, %142 : vector<16x1xf32>
    %144 = math.rsqrt %143 : vector<16x1xf32>
    %145 = vector.broadcast %144 : vector<16x1xf32> to vector<16x128xf32>
    %146 = arith.mulf %136, %145 : vector<16x128xf32>
    %c0_63 = arith.constant 0 : index
    %c0_64 = arith.constant 0 : index
    %c0_65 = arith.constant 0 : index
    %147 = vector.load %arg13[%c0_63, %c0_64, %c0_65] : memref<1x1x128xf32, #tpu.memory_space<vmem>>, vector<1x1x128xf32>
    %148 = vector.shape_cast %147 : vector<1x1x128xf32> to vector<1x128xf32>
    %149 = vector.broadcast %148 : vector<1x128xf32> to vector<16x128xf32>
    %150 = arith.mulf %146, %149 : vector<16x128xf32>
    %c0_66 = arith.constant 0 : index
    %c0_67 = arith.constant 0 : index
    %c0_68 = arith.constant 0 : index
    %151 = vector.load %arg14[%c0_66, %c0_67, %c0_68] : memref<1x1x128xf32, #tpu.memory_space<vmem>>, vector<1x1x128xf32>
    %152 = vector.shape_cast %151 : vector<1x1x128xf32> to vector<1x128xf32>
    %153 = vector.broadcast %152 : vector<1x128xf32> to vector<16x128xf32>
    %154 = arith.addf %150, %153 : vector<16x128xf32>
    %c0_69 = arith.constant 0 : index
    %c0_70 = arith.constant 0 : index
    %c0_71 = arith.constant 0 : index
    %155 = vector.load %arg15[%c0_69, %c0_70, %c0_71] : memref<1x16x128xf32, #tpu.memory_space<vmem>>, vector<1x16x128xf32>
    %156 = vector.shape_cast %155 : vector<1x16x128xf32> to vector<16x128xf32>
    %157 = vector.shape_cast %154 : vector<16x128xf32> to vector<1x16x128xf32>
    tpu.vector_store %arg15[%c0_69, %c0_70, %c0_71], %157 {strides = array<i32>} : memref<1x16x128xf32, #tpu.memory_space<vmem>>, vector<1x16x128xf32>,
    return
  }
  func.func @transform_0(%arg0: i32, %arg1: i32) -> (i32, i32, i32) {
    %c0_i32 = arith.constant 0 : i32
    %c0_i32_0 = arith.constant 0 : i32
    %c0_i32_1 = arith.constant 0 : i32
    return %arg0, %c0_i32, %c0_i32_0 : i32, i32, i32
  }
  func.func @transform_1(%arg0: i32, %arg1: i32) -> (i32, i32, i32) {
    %c0_i32 = arith.constant 0 : i32
    %c0_i32_0 = arith.constant 0 : i32
    %c0_i32_1 = arith.constant 0 : i32
    return %arg1, %c0_i32, %c0_i32_0 : i32, i32, i32
  }
  func.func @transform_2(%arg0: i32, %arg1: i32) -> (i32, i32, i32) {
    %c0_i32 = arith.constant 0 : i32
    %c0_i32_0 = arith.constant 0 : i32
    %c0_i32_1 = arith.constant 0 : i32
    return %arg1, %c0_i32, %c0_i32_0 : i32, i32, i32
  }
  func.func @transform_3(%arg0: i32, %arg1: i32) -> (i32, i32, i32) {
    %c0_i32 = arith.constant 0 : i32
    %c0_i32_0 = arith.constant 0 : i32
    %c0_i32_1 = arith.constant 0 : i32
    return %arg1, %c0_i32, %c0_i32_0 : i32, i32, i32
  }
  func.func @transform_4(%arg0: i32, %arg1: i32) -> (i32, i32, i32) {
    %c0_i32 = arith.constant 0 : i32
    %c0_i32_0 = arith.constant 0 : i32
    %c0_i32_1 = arith.constant 0 : i32
    return %arg1, %c0_i32, %c0_i32_0 : i32, i32, i32
  }
  func.func @transform_5(%arg0: i32, %arg1: i32) -> (i32, i32, i32) {
    %c0_i32 = arith.constant 0 : i32
    %c0_i32_0 = arith.constant 0 : i32
    %c0_i32_1 = arith.constant 0 : i32
    return %arg1, %c0_i32, %c0_i32_0 : i32, i32, i32
  }
  func.func @transform_6(%arg0: i32, %arg1: i32) -> (i32, i32, i32) {
    %c0_i32 = arith.constant 0 : i32
    %c0_i32_0 = arith.constant 0 : i32
    %c0_i32_1 = arith.constant 0 : i32
    return %arg1, %c0_i32, %c0_i32_0 : i32, i32, i32
  }
  func.func @transform_7(%arg0: i32, %arg1: i32) -> (i32, i32, i32) {
    %c0_i32 = arith.constant 0 : i32
    %c0_i32_0 = arith.constant 0 : i32
    %c0_i32_1 = arith.constant 0 : i32
    return %arg1, %c0_i32, %c0_i32_0 : i32, i32, i32
  }
  func.func @transform_8(%arg0: i32, %arg1: i32) -> (i32, i32, i32) {
    %c0_i32 = arith.constant 0 : i32
    %c0_i32_0 = arith.constant 0 : i32
    %c0_i32_1 = arith.constant 0 : i32
    return %arg1, %c0_i32, %c0_i32_0 : i32, i32, i32
  }
  func.func @transform_9(%arg0: i32, %arg1: i32) -> (i32, i32, i32) {
    %c0_i32 = arith.constant 0 : i32
    %c0_i32_0 = arith.constant 0 : i32
    %c0_i32_1 = arith.constant 0 : i32
    return %arg1, %c0_i32, %c0_i32_0 : i32, i32, i32
  }
  func.func @transform_10(%arg0: i32, %arg1: i32) -> (i32, i32, i32) {
    %c0_i32 = arith.constant 0 : i32
    %c0_i32_0 = arith.constant 0 : i32
    %c0_i32_1 = arith.constant 0 : i32
    return %arg1, %c0_i32, %c0_i32_0 : i32, i32, i32
  }
  func.func @transform_11(%arg0: i32, %arg1: i32) -> (i32, i32, i32) {
    %c0_i32 = arith.constant 0 : i32
    %c0_i32_0 = arith.constant 0 : i32
    %c0_i32_1 = arith.constant 0 : i32
    return %arg1, %c0_i32, %c0_i32_0 : i32, i32, i32
  }
  func.func @transform_12(%arg0: i32, %arg1: i32) -> (i32, i32, i32) {
    %c0_i32 = arith.constant 0 : i32
    %c0_i32_0 = arith.constant 0 : i32
    %c0_i32_1 = arith.constant 0 : i32
    return %arg1, %c0_i32, %c0_i32_0 : i32, i32, i32
  }
  func.func @transform_13(%arg0: i32, %arg1: i32) -> (i32, i32, i32) {
    %c0_i32 = arith.constant 0 : i32
    %c0_i32_0 = arith.constant 0 : i32
    %c0_i32_1 = arith.constant 0 : i32
    return %arg0, %c0_i32, %c0_i32_0 : i32, i32, i32
  }
}

</mosaic_0001>

<bundles_post_ra>
// kernel: tpu_custom_call.1
= control target key start
LH: loop header
LB: loop body
LE: loop exit
PB: predicated region body
PF: predicated region fallthrough
CT: control target
= control target key end

     0   :  { %s4154_s0 = inlined_call_operand.hbm [shape: f32[2,16,128], index: 0, kind: input, shape index: {}]   ;;  %s4155_s1 = inlined_call_operand.hbm [shape: bf16[4,128,384], index: 1, kind: input, shape index: {}]   ;;  %s4156_s2 = inlined_call_operand.hbm [shape: f32[4,1,384], index: 2, kind: input, shape index: {}]   ;;  %s4157_s3 = inlined_call_operand.hbm [shape: bf16[4,128,128], index: 3, kind: input, shape index: {}]   ;;  %s4158_s4 = inlined_call_operand.vmem [shape: f32[4,1,128], index: 4, kind: input, shape index: {}]   ;;  %s4159_s5 = inlined_call_operand.hbm [shape: f32[4,1,128], index: 5, kind: input, shape index: {}]   ;;  %s4160_s6 = inlined_call_operand.hbm [shape: f32[4,1,128], index: 6, kind: input, shape index: {}]   ;;  %s4161_s7 = inlined_call_operand.hbm [shape: bf16[4,128,256], index: 7, kind: input, shape index: {}]   ;;  %s4162_s8 = inlined_call_operand.vmem [shape: f32[4,1,256], index: 8, kind: input, shape index: {}]   ;;  %s4163_s9 = inlined_call_operand.hbm [shape: bf16[4,256,128], index: 9, kind: input, shape index: {}]   ;;  %s4164_s10 = inlined_call_operand.vmem [shape: f32[4,1,128], index: 10, kind: input, shape index: {}]   ;;  %s4165_s11 = inlined_call_operand.vmem [shape: f32[4,1,128], index: 11, kind: input, shape index: {}]   ;;  %s4166_s12 = inlined_call_operand.hbm [shape: f32[4,1,128], index: 12, kind: input, shape index: {}]   ;;  %s4167_s13 = inlined_call_operand.hbm [shape: f32[2,16,128], index: 13, kind: output, shape index: {}]  }
   0x1   :  { %4198 = sst [smem:[#allocation41_spill]] %s4154_s0 }
   0x2   :  { %4199 = sst [smem:[#allocation42_spill]] %s4155_s1 }
   0x3   :  { %4200 = sst [smem:[#allocation43_spill]] %s4156_s2 }
   0x4   :  { %4201 = sst [smem:[#allocation44_spill]] %s4157_s3 }
   0x5   :  { %4202 = sst [smem:[#allocation45_spill]] %s4158_s4 }
   0x6   :  { %4203 = sst [smem:[#allocation46_spill]] %s4159_s5 }
   0x7   :  { %4204 = sst [smem:[#allocation47_spill]] %s4160_s6 }
   0x8   :  { %4205 = sst [smem:[#allocation48_spill]] %s4161_s7 }
   0x9   :  { %4206 = sst [smem:[#allocation49_spill]] %s4162_s8 }
   0xa   :  { %4207 = sst [smem:[#allocation50_spill]] %s4163_s9 }
   0xb   :  { %4208 = sst [smem:[#allocation51_spill]] %s4164_s10 }
   0xc   :  { %4209 = sst [smem:[#allocation52_spill]] %s4165_s11 }
   0xd   :  { %4210 = sst [smem:[#allocation53_spill]] %s4166_s12 }
   0xe   :  { %4211 = sst [smem:[#allocation54_spill]] %s4167_s13 }
   0xf   :  { %18 = vsyncpa [#allocation3], 0 }
  0x10   :  { %20 = vsyncpa [#allocation3 + $0x1], 0 }
  0x11   :  { %21 = vsyncpa [#allocation6], 0 }
  0x12   :  { %23 = vsyncpa [#allocation6 + $0x1], 0 }
  0x13   :  { %24 = vsyncpa [#allocation9], 0 }
  0x14   :  { %26 = vsyncpa [#allocation9 + $0x1], 0 }
  0x15   :  { %27 = vsyncpa [#allocation12], 0 }
  0x16   :  { %29 = vsyncpa [#allocation12 + $0x1], 0 }
  0x17   :  { %30 = vsyncpa [#allocation15], 0 }
  0x18   :  { %32 = vsyncpa [#allocation15 + $0x1], 0 }
  0x19   :  { %33 = vsyncpa [#allocation4], 0 }
  0x1a   :  { %35 = vsyncpa [#allocation4 + $0x1], 0  ;;  %s3484_s25 = smov 0   ;;  %s3486_s26 = smov 0  }
  0x1b   :  { %s3488_s27 = smov 0   ;;  %s3490_s28 = smov 0  }
  0x1c   :  { %s3492_s29 = smov 0   ;;  %s3494_s30 = smov 0  }
  0x1d   :  { %s3496_s14 = smov 0   ;;  %s3498_s15 = smov 0  }
  0x1e   :  { %s3500_s16 = smov 0   ;;  %s3502_s17 = smov 0  }
  0x1f   :  { %s3504_s18 = smov 0  }
  0x20 LB: > { %4212 = sst [smem:[#allocation24_spill]] %s3348_s25  ;;  %p68_p0 = scmp.eq.s32.totalorder %s3388_s18, 0  ;;  %s3388_s18 = sphi %s3504_s18, %s41_s18   ;;  %s3384_s17 = sphi %s3502_s17, %s4292_s17   ;;  %s3380_s16 = sphi %s3500_s16, %s4296_s16   ;;  %s3376_s15 = sphi %s3498_s15, %s4290_s15   ;;  %s3372_s14 = sphi %s3496_s14, %s4295_s14   ;;  %s3368_s30 = sphi %s3494_s30, %s4289_s30   ;;  %s3364_s29 = sphi %s3492_s29, %s4294_s29   ;;  %s3360_s28 = sphi %s3490_s28, %s4293_s28   ;;  %s3356_s27 = sphi %s3488_s27, %s4287_s27   ;;  %s3352_s26 = sphi %s3486_s26, %s4286_s26   ;;  %s3348_s25 = sphi %s3484_s25, %s4285_s25  }
  0x21   : > { %4213 = sst [smem:[#allocation25_spill]] %s3352_s26  ;;  %p93_p1 = scmp.ne.s32.totalorder %s3356_s27, %s3352_s26 }
  0x22   : > { %4214 = sst [smem:[#allocation26_spill]] %s3356_s27  ;;  %p4177_p2 = scmp.lt.s32.totalorder %s3388_s18, 8 }
  0x23   : > { %4215 = sst [smem:[#allocation27_spill]] %s3360_s28  ;;  %s3545_s20 = sand.u32 1, %s3388_s18  }
  0x24   : > { %4216 = sst [smem:[#allocation28_spill]] %s3368_s30  ;;  %p95_p3 = por %p93_p1, %p68_p0 }
  0x25   : > { %4217 = sst [smem:[#allocation29_spill]] %s3372_s14  ;;  %s3550_s21 = sand.u32 1, %s3356_s27  }
  0x26   : > { %4218 = sst [smem:[#allocation30_spill]] %s3376_s15  ;;  %s2704_s22 = smul.u32 3072, %s3380_s16 }
  0x27   : > { %4219 = sst [smem:[#allocation31_spill]] %s3384_s17  ;;  %s2703_s23 = smul.u32 192, %s3550_s21 }
  0x28   : > { %4220 = sst [smem:[#allocation32_spill]] %s3388_s18  ;;  %p3556_p4 = pnand %p4177_p2, %p95_p3 }
  0x29   : > { %s4222_s1 = sld [smem:[#allocation42_spill]]  ;;  %s460_s11 = scalar_lea.vmem [#allocation5], %s2703_s23 }
  0x2a   : > { %s467_s10 = sshll.u32 %s460_s11, 4  ;;  %p2463_p5 = scmp.ge.s32.totalorder %s3388_s18, 1  ;;  %s468_s10 = int_to_ptr.vmem [resolvable:$true] %s467_s10 }
  0x2b   : > { %s4172_s8 = scalar_lea.sflag [#allocation6], %s3545_s20  ;;  %p3567_p6 = pneg %p3556_p4 }
  0x2c   : > { %s3013_s14 = scalar_lea.vmem %s468_s10, 3072  ;;  %s3390_s12 = smov [#allocation5]  }
  0x2d   : > { %p3014_p7 = scmp.ne.s32.totalorder %s468_s10, %s3013_s14  ;;  %s3018_s13 = sshll.u32 %s3390_s12, 4  ;;  %s3019_s13 = int_to_ptr.vmem [resolvable:$false] %s3018_s13 }
  0x2e   : > { %s3020_s15 = scalar_lea.vmem %s3019_s13, 6144  ;;  %p3021_p10 = scmp.lt.s32.totalorder %s468_s10, %s3019_s13 }
  0x2f   : > { %s466_s19 = scalar_lea.hbm %s4222_s1, %s2704_s22  ;;  %p3016_p8 = pnand %p3014_p7, %p3567_p6 }
  0x30   : > { %p3022_p11 = scmp.lt.s32.totalorder %s3020_s15, %s3013_s14 }
  0x31   : > { %p3017_p9 = pneg %p3016_p8 }
  0x32   : > { %p3023_p12 = por %p3022_p11, %p3021_p10 }
  0x34   : > { %p3024_p13 = pnand %p3023_p12, %p3017_p9 }
  0x36   : > { %3027 = shalt.err (!%p3024_p13)
}
  0x37   : > { %s3391_s11 = smov 192   ;;  %s3392_s22 = smov 12  }
  0x38   : > { %2735 = dma.hbm_to_vmem [thread:$0]  (!%p3556_p4), %s466_s19, 3072, %s468_s10, %s4172_s8, %s3391_s11, %s3391_s11, %s3392_s22  }
  0x39   : > { %p633_p1 = scmp.lt.s32.totalorder %s3388_s18, 9  ;;  %s2451_s12 = sshll.u32 %s3550_s21, 6 }
  0x3a   : > { %s2555_s14 = sshll.u32 %s3380_s16, 10  ;;  %s4226_s3 = sld [smem:[#allocation44_spill]] }
  0x3b   : > { %p3582_p3 = pnand %p2463_p5, %p633_p1  ;;  %s500_s2 = scalar_lea.vmem [#allocation8], %s2451_s12 }
  0x3c   : > { %s507_s5 = sshll.u32 %s500_s2, 4  ;;  %s3590_s0 = sshll.u32 %s3380_s16, 4  ;;  %s508_s5 = int_to_ptr.vmem [resolvable:$true] %s507_s5 }
  0x3d   : > { %s4224_s23 = scalar_select %p3582_p3, 1, 0 }
  0x3e   : > { %s4174_s26 = scalar_lea.sflag [#allocation9], %s3545_s20  ;;  %s3041_s25 = scalar_lea.vmem %s508_s5, 1024 }
  0x3f   : > { %4225 = sst [smem:[#allocation33_spill]] %s4224_s23  ;;  %p3042_p7 = scmp.ne.s32.totalorder %s508_s5, %s3041_s25 }
  0x40   : > { %s506_s1 = scalar_lea.hbm %s4226_s3, %s2555_s14  ;;  %s3393_s10 = smov [#allocation8]  }
  0x41   : > { %p3044_p8 = pnand %p3042_p7, %p3567_p6  ;;  %s3046_s19 = sshll.u32 %s3393_s10, 4  ;;  %s3047_s19 = int_to_ptr.vmem [resolvable:$false] %s3046_s19 }
  0x42   : > { %s3048_s11 = scalar_lea.vmem %s3047_s19, 2048  ;;  %p3049_p5 = scmp.lt.s32.totalorder %s508_s5, %s3047_s19 }
  0x43   : > { %p3045_p9 = pneg %p3044_p8  ;;  %p3050_p10 = scmp.lt.s32.totalorder %s3048_s11, %s3041_s25 }
  0x45   : > { %p3051_p11 = por %p3050_p10, %p3049_p5 }
  0x47   : > { %p3052_p12 = pnand %p3051_p11, %p3045_p9 }
  0x49   : > { %3055 = shalt.err (!%p3052_p12)
}
  0x4a   : > { %s4175_s22 = smov 64   ;;  %s4176_s2 = smov 4  }
  0x4b   : > { %2741 = dma.hbm_to_vmem [thread:$0]  (!%p3556_p4), %s506_s1, 1024, %s508_s5, %s4174_s26, %s4175_s22, %s4175_s22, %s4176_s2  }
  0x4c   : > { %s4227_s6 = sld [smem:[#allocation47_spill]]  ;;  %s543_s13 = scalar_lea.vmem [#allocation11], %s3550_s21 }
  0x4d   : > { %s550_s15 = sshll.u32 %s543_s13, 4  ;;  %s2456_s10 = sshll.u32 %s3550_s21, 7  ;;  %s551_s15 = int_to_ptr.vmem [resolvable:$true] %s550_s15 }
  0x4e   : > { %s4180_s19 = scalar_lea.sflag [#allocation12], %s3545_s20  ;;  %s3069_s11 = scalar_lea.vmem %s551_s15, 16 }
  0x4f   : > { %p3070_p13 = scmp.ne.s32.totalorder %s551_s15, %s3069_s11  ;;  %s3396_s8 = smov [#allocation11]  }
  0x50   : > { %s3074_s3 = sshll.u32 %s3396_s8, 4  ;;  %s3075_s3 = int_to_ptr.vmem [resolvable:$false] %s3074_s3 }
  0x51   : > { %p3072_p1 = pnand %p3070_p13, %p3567_p6  ;;  %s3076_s23 = scalar_lea.vmem %s3075_s3, 32 }
  0x52   : > { %s548_s14 = scalar_lea.hbm %s4227_s6, %s3590_s0  ;;  %p3077_p8 = scmp.lt.s32.totalorder %s551_s15, %s3075_s3 }
  0x53   : > { %p3073_p7 = pneg %p3072_p1  ;;  %p3078_p9 = scmp.lt.s32.totalorder %s3076_s23, %s3069_s11 }
  0x55   : > { %p3079_p5 = por %p3078_p9, %p3077_p8 }
  0x57   : > { %p3080_p10 = pnand %p3079_p5, %p3073_p7 }
  0x59   : > { %3083 = shalt.err (!%p3080_p10)
}
  0x5a   : > { %2747 = dma.hbm_to_vmem [thread:$0]  (!%p3556_p4), %s548_s14, 16, %s551_s15, %s4180_s19  }
  0x5b   : > { %s2556_s1 = sshll.u32 %s3380_s16, 11  ;;  %s4228_s7 = sld [smem:[#allocation48_spill]] }
  0x5c   : > { %s561_s25 = scalar_lea.vmem [#allocation13], %s2456_s10  ;;  %s4229_s9 = sld [smem:[#allocation50_spill]] }
  0x5d   : > { %s568_s3 = sshll.u32 %s561_s25, 4  ;;  %s589_s26 = scalar_lea.vmem [#allocation14], %s2456_s10  ;;  %s3621_s3 = int_to_ptr.vmem [resolvable:$true] %s568_s3 }
  0x5e   : > { %s596_s22 = sshll.u32 %s589_s26, 4  ;;  %s4178_s2 = scalar_lea.sflag [#allocation15], %s3545_s20  ;;  %s597_s22 = int_to_ptr.vmem [resolvable:$true] %s596_s22 }
  0x5f   : > { %s3097_s6 = scalar_lea.vmem %s597_s22, 2048  ;;  %s3397_s14 = smov [#allocation14]  }
  0x60   : > { %p3098_p11 = scmp.ne.s32.totalorder %s597_s22, %s3097_s6  ;;  %s3102_s15 = sshll.u32 %s3397_s14, 4  ;;  %s3103_s15 = int_to_ptr.vmem [resolvable:$false] %s3102_s15 }
  0x61   : > { %s3619_s8 = scalar_lea.hbm %s4228_s7, %s2556_s1  ;;  %s3104_s5 = scalar_lea.vmem %s3103_s15, 4096 }
  0x62   : > { %s595_s11 = scalar_lea.hbm %s4229_s9, %s2556_s1  ;;  %p3100_p12 = pnand %p3098_p11, %p3567_p6 }
  0x63   : > { %p3105_p1 = scmp.lt.s32.totalorder %s597_s22, %s3103_s15  ;;  %p3106_p7 = scmp.lt.s32.totalorder %s3104_s5, %s3097_s6 }
  0x64   : > { %p3101_p13 = pneg %p3100_p12 }
  0x65   : > { %p3107_p8 = por %p3106_p7, %p3105_p1 }
  0x67   : > { %p3108_p9 = pnand %p3107_p8, %p3101_p13 }
  0x69   : > { %3111 = shalt.err (!%p3108_p9)
}
  0x6a   : > { %s4230_s10 = smov 4   ;;  %s4231_s26 = smov 64  }
  0x6b   : > { %2753 = dma.hbm_to_vmem [thread:$0]  (!%p3556_p4), %s595_s11, 2048, %s597_s22, %s4178_s2, %s4231_s26, %s4231_s26, %s4230_s10  }
  0x6c   : > { %s3637_s6 = sadd.s32 4294967295, %s3388_s18   ;;  %s2443_s1 = sadd.s32 4294967294, %s3388_s18  }
  0x6d   : > { %4232 = sst [smem:[#allocation34_spill]] %s3637_s6  ;;  %s50_s12 = sadd.s32 1, %s3380_s16 }
  0x6e   : > { %s53_s25 = sadd.s32 1, %s3384_s17  ;;  %s4233_s23 = sld [smem:[#allocation24_spill]] }
  0x6f   : > { %s4234_s13 = sld [smem:[#allocation25_spill]]  ;;  %p51_p5 = scmp.ge.s32.totalorder %s50_s12, 4 }
  0x70   : > { %s60_s14 = sadd.s32 1, %s3368_s30  ;;  %p67_p10 = scmp.ne.s32.totalorder %s3368_s30, %s3364_s29 }
  0x71   : > { %p4179_p11 = scmp.ne.s32.totalorder %s3364_s29, %s3360_s28  ;;  %s4298_s12 = smov (%p51_p5, %s50_s12), 0 }
  0x72   : > { %4235 = sst [smem:[#allocation35_spill]] %s4298_s12  ;;  %s4300_s25 = smov (!%p51_p5, %s53_s25), %s3384_s17 }
  0x73   : > { %p3655_p12 = por %p68_p0, %p67_p10  ;;  %p74_p13 = scmp.eq.s32.totalorder %s3637_s6, 0 }
  0x74   : > { %p55_p1 = scmp.ge.s32.totalorder %s4300_s25, 2  ;;  %s83_s11 = ssub.s32 %s3380_s16, %s4298_s12 }
  0x75   : > { %p3665_p7 = por %p74_p13, %p4179_p11  ;;  %p84_p8 = scmp.eq.s32.totalorder %s83_s11, 0 }
  0x76   : > { %s4302_s25 = smov (%p55_p1, %s4300_s25), 0  ;;  %s4239_s5 = sadd.s32 1, %s3356_s27 }
  0x77   : > { %s4237_s15 = scalar_select %p3665_p7, 1, 0 }
  0x78   : > { %4238 = sst [smem:[#allocation36_spill]] %s4302_s25  ;;  %s57_s26 = ssub.s32 %s3384_s17, %s4302_s25 }
  0x79   : > { %s3674_s10 = scalar_select %p84_p8, %s3356_s27, %s4239_s5  }
  0x7a   : > { %p99_p0 = scmp.ne.s32.totalorder %s4234_s13, %s4233_s23  ;;  %p58_p9 = scmp.eq.s32.totalorder %s57_s26, 0 }
  0x7b   : > { %4240 = sst [smem:[#allocation37_spill]] %s3674_s10  ;;  %p409_p5 = scmp.eq.s32.totalorder %s3637_s6, 7 }
  0x7c   : > { %p3681_p2 = por %p99_p0, %p74_p13  ;;  %p415_p11 = scmp.eq.s32.totalorder %s2443_s1, 7 }
  0x7d   : > { %s3686_s19 = scalar_select %p58_p9, %s3368_s30, %s60_s14  }
  0x7e   : > { %s4241_s2 = scalar_select %p3681_p2, 1, 0 }
  0x7f   : > { %4243 = sst [smem:[#allocation38_spill]] %s3686_s19  ;;  %p3691_p1 = por %p409_p5, %p67_p10 }
  0x80   : > { %4242 = sst [smem:[#allocation24_spill]] %s4241_s2  ;;  %p4246_p8 = scmp.ne.s32.totalorder %s3364_s29, %s3360_s28 }
  0x81   : > { %s4244_s11 = scalar_select %p3691_p1, 1, 0 }
  0x82   : > { %p3698_p7 = por %p415_p11, %p4246_p8  ;;  %s435_s23 = sand.u32 1, %s3368_s30  }
  0x83   : > { %4245 = sst [smem:[#allocation39_spill]] %s4244_s11  ;;  %s2554_s13 = sshll.u32 %s3384_s17, 8 }
  0x84   : > { %s4247_s5 = scalar_select %p3698_p7, 1, 0 }
  0x85   : > { %s2446_s26 = sshll.u32 %s435_s23, 4  ;;  %s4249_s25 = sld [smem:[#allocation41_spill]] }
  0x86   : > { %4248 = sst [smem:[#allocation40_spill]] %s4247_s5  ;;  %s439_s1 = scalar_lea.vmem [#allocation2], %s2446_s26 }
  0x87   : > { %s446_s14 = sshll.u32 %s439_s1, 4  ;;  %p4250_p13 = scmp.lt.s32.totalorder %s3388_s18, 8  ;;  %s447_s14 = int_to_ptr.vmem [resolvable:$true] %s446_s14 }
  0x88   : > { %s436_s10 = scalar_lea.sflag [#allocation3], %s435_s23  ;;  %s3125_s30 = scalar_lea.vmem %s447_s14, 256 }
  0x89   : > { %p3711_p10 = pnand %p4250_p13, %p3655_p12  ;;  %p3126_p0 = scmp.ne.s32.totalorder %s447_s14, %s3125_s30 }
  0x8a   : > { %s3398_s17 = smov [#allocation2]  }
  0x8b   : > { %s445_s12 = scalar_lea.hbm %s4249_s25, %s2554_s13  ;;  %p3114_p11 = pneg %p3711_p10 }
  0x8c   : > { %s3130_s7 = sshll.u32 %s3398_s17, 4  ;;  %s3131_s7 = int_to_ptr.vmem [resolvable:$false] %s3130_s7 }
  0x8d   : > { %p3128_p9 = pnand %p3126_p0, %p3114_p11  ;;  %s3132_s9 = scalar_lea.vmem %s3131_s7, 512 }
  0x8e   : > { %p3133_p8 = scmp.lt.s32.totalorder %s447_s14, %s3131_s7  ;;  %p3134_p7 = scmp.lt.s32.totalorder %s3132_s9, %s3125_s30 }
  0x8f   : > { %p3129_p5 = pneg %p3128_p9 }
  0x90   : > { %p3135_p1 = por %p3134_p7, %p3133_p8 }
  0x92   : > { %p3136_p12 = pnand %p3135_p1, %p3129_p5 }
  0x94   : > { %3139 = shalt.err (!%p3136_p12)
}
  0x95   : > { %s3399_s25 = smov 128   ;;  %s3400_s22 = smov 8  }
  0x96   : > { %2732 = dma.hbm_to_vmem [thread:$0]  (!%p3711_p10), %s445_s12, 256, %s447_s14, %s436_s10, %s3399_s25, %s3399_s25, %s3400_s22  }
  0x97   : > { %s2705_s17 = smul.u32 3, %s3550_s21  ;;  %s4252_s26 = sld [smem:[#allocation46_spill]] }
  0x98   : > { %s2706_s23 = smul.u32 48, %s3380_s16  ;;  %s526_s9 = scalar_lea.vmem [#allocation10], %s3550_s21 }
  0x99   : > { %s533_s27 = sshll.u32 %s526_s9, 4  ;;  %s4254_s18 = sld [smem:[#allocation43_spill]]  ;;  %s3732_s27 = int_to_ptr.vmem [resolvable:$true] %s533_s27 }
  0x9a   : > { %s481_s2 = scalar_lea.vmem [#allocation7], %s2705_s17  ;;  %s3401_s12 = smov [#allocation7]  }
  0x9b   : > { %s489_s6 = sshll.u32 %s481_s2, 4  ;;  %s3158_s10 = sshll.u32 %s3401_s12, 4  ;;  %s490_s6 = int_to_ptr.vmem [resolvable:$true] %s489_s6  ;;  %s3159_s10 = int_to_ptr.vmem [resolvable:$false] %s3158_s10 }
  0x9c   : > { %s3153_s19 = scalar_lea.vmem %s490_s6, 48  ;;  %s3160_s14 = scalar_lea.vmem %s3159_s10, 96 }
  0x9d   : > { %s531_s7 = scalar_lea.hbm %s4252_s26, %s3590_s0  ;;  %p3154_p7 = scmp.ne.s32.totalorder %s490_s6, %s3153_s19 }
  0x9e   : > { %p3161_p10 = scmp.lt.s32.totalorder %s490_s6, %s3159_s10  ;;  %p3162_p11 = scmp.lt.s32.totalorder %s3160_s14, %s3153_s19 }
  0x9f   : > { %s487_s11 = scalar_lea.hbm %s4254_s18, %s2706_s23  ;;  %p3156_p1 = pnand %p3154_p7, %p3567_p6 }
  0xa0   : > { %p3163_p0 = por %p3162_p11, %p3161_p10 }
  0xa1   : > { %p3157_p13 = pneg %p3156_p1 }
  0xa3   : > { %p3164_p9 = pnand %p3163_p0, %p3157_p13 }
  0xa5   : > { %3167 = shalt.err (!%p3164_p9)
}
  0xa6   : > { %s4255_s28 = scalar_lea.sflag [#allocation6], %s3545_s20  ;;  %s3181_s18 = scalar_lea.vmem %s3732_s27, 16 }
  0xa7   : > { %2738 = dma.hbm_to_vmem [thread:$0]  (!%p3556_p4), %s487_s11, 48, %s490_s6, %s4255_s28  }
  0xa8   : > { %p3182_p5 = scmp.ne.s32.totalorder %s3732_s27, %s3181_s18  ;;  %s3402_s2 = smov [#allocation10]  }
  0xa9   : > { %s3186_s5 = sshll.u32 %s3402_s2, 4  ;;  %s3187_s5 = int_to_ptr.vmem [resolvable:$false] %s3186_s5 }
  0xaa   : > { %p3184_p8 = pnand %p3182_p5, %p3567_p6  ;;  %s3188_s17 = scalar_lea.vmem %s3187_s5, 32 }
  0xab   : > { %p3189_p7 = scmp.lt.s32.totalorder %s3732_s27, %s3187_s5  ;;  %p3190_p1 = scmp.lt.s32.totalorder %s3188_s17, %s3181_s18 }
  0xac   : > { %p3185_p12 = pneg %p3184_p8 }
  0xad   : > { %p3191_p13 = por %p3190_p1, %p3189_p7 }
  0xaf   : > { %p3192_p10 = pnand %p3191_p13, %p3185_p12 }
  0xb1   : > { %3195 = shalt.err (!%p3192_p10)
}
  0xb2   : > { %s4256_s23 = scalar_lea.sflag [#allocation9], %s3545_s20  ;;  %s3209_s13 = scalar_lea.vmem %s3621_s3, 2048 }
  0xb3   : > { %2744 = dma.hbm_to_vmem [thread:$0]  (!%p3556_p4), %s531_s7, 16, %s3732_s27, %s4256_s23  }
  0xb4   : > { %p3210_p11 = scmp.ne.s32.totalorder %s3621_s3, %s3209_s13  ;;  %s3403_s30 = smov [#allocation13]  }
  0xb5   : > { %s3214_s26 = sshll.u32 %s3403_s30, 4  ;;  %s3215_s26 = int_to_ptr.vmem [resolvable:$false] %s3214_s26 }
  0xb6   : > { %p3212_p0 = pnand %p3210_p11, %p3567_p6  ;;  %s3216_s9 = scalar_lea.vmem %s3215_s26, 4096 }
  0xb7   : > { %p3217_p5 = scmp.lt.s32.totalorder %s3621_s3, %s3215_s26  ;;  %p3218_p8 = scmp.lt.s32.totalorder %s3216_s9, %s3209_s13 }
  0xb8   : > { %p3213_p9 = pneg %p3212_p0 }
  0xb9   : > { %p3219_p12 = por %p3218_p8, %p3217_p5 }
  0xbb   : > { %p3220_p7 = pnand %p3219_p12, %p3213_p9 }
  0xbd   : > { %3223 = shalt.err (!%p3220_p7)
}
  0xbe   : > { %s4257_s27 = scalar_lea.sflag [#allocation12], %s3545_s20  ;;  %s4258_s12 = sld [smem:[#allocation53_spill]] }
  0xbf   : > { %2750 = dma.hbm_to_vmem [thread:$0]  (!%p3556_p4), %s3619_s8, 2048, %s3621_s3, %s4257_s27, %s3399_s25, %s3399_s25, %s3400_s22  }
  0xc0   : > { %s621_s14 = scalar_lea.vmem [#allocation16], %s3550_s21  ;;  %s3404_s2 = smov [#allocation16]  }
  0xc1   : > { %s628_s28 = sshll.u32 %s621_s14, 4  ;;  %s3242_s5 = sshll.u32 %s3404_s2, 4  ;;  %s629_s28 = int_to_ptr.vmem [resolvable:$true] %s628_s28  ;;  %s3243_s5 = int_to_ptr.vmem [resolvable:$false] %s3242_s5 }
  0xc2   : > { %s3237_s18 = scalar_lea.vmem %s629_s28, 16  ;;  %s3244_s17 = scalar_lea.vmem %s3243_s5, 32 }
  0xc3   : > { %p3238_p1 = scmp.ne.s32.totalorder %s629_s28, %s3237_s18  ;;  %p3245_p11 = scmp.lt.s32.totalorder %s629_s28, %s3243_s5 }
  0xc4   : > { %s626_s10 = scalar_lea.hbm %s4258_s12, %s3590_s0  ;;  %p3246_p0 = scmp.lt.s32.totalorder %s3244_s17, %s3237_s18 }
  0xc5   : > { %p3240_p13 = pnand %p3238_p1, %p3567_p6 }
  0xc6   : > { %p3247_p9 = por %p3246_p0, %p3245_p11 }
  0xc7   : > { %p3241_p10 = pneg %p3240_p13 }
  0xc9   : > { %p3248_p5 = pnand %p3247_p9, %p3241_p10 }
  0xcb   : > { %3251 = shalt.err (!%p3248_p5)
}
  0xcc   : > { %s4259_s0 = scalar_lea.sflag [#allocation15], %s3545_s20  ;;  %637 = sbr.rel (%p3582_p3) target bundleno = 3110 (0xc26), region = 72 }
  0xcd   : > { %2756 = dma.hbm_to_vmem [thread:$0]  (!%p3556_p4), %s626_s10, 16, %s629_s28, %s4259_s0  }
  0xce   : > { %s3783_s4 = sand.u32 (!%p3582_p3), 1, %s3364_s29   ;;  %p4261_p6 = scmp.ne.s32.totalorder (!%p3582_p3), %s4237_s15, 0 }
  0xcf   : > { %s4197_s8 = sshll.u32 (!%p3582_p3), %s3783_s4, 4  ;;  %s640_s3 = scalar_lea.sflag (!%p3582_p3), [#allocation3], %s3783_s4 }
  0xd0   : > { %s3789_s25 = scalar_lea.vmem (!%p3582_p3), [#allocation2], %s4197_s8 }
  0xd1   : > { %3323 = dma.done.wait (%p4261_p6), %s640_s3, 256  }
  0xd2   : > { %3325 = vsyncadd (%p4261_p6), %s640_s3, 4294967040  ;;  %s4262_s20 = sld [smem:[#allocation34_spill]] }
  0xd3   : > { %s4263_s24 = sld [smem:[#allocation25_spill]] }
  0xd8   : > { %s648_s23 = sand.u32 1, %s4262_s20  }
  0xd9   : > { %s3797_s6 = sand.u32 1, %s4263_s24   ;;  %s649_s13 = scalar_lea.sflag [#allocation6], %s648_s23 }
  0xda   : > { %s2707_s11 = smul.u32 192, %s3797_s6 }
  0xdc   : > { %s3800_s30 = scalar_lea.vmem [#allocation5], %s2707_s11 }
  0xdd   : > { %3327 = dma.done.wait (%p3681_p2), %s649_s13, 3120  }
  0xde   : > { %3329 = vsyncadd (%p3681_p2), %s649_s13, 4294964176  ;;  %s2708_s15 = smul.u32 3, %s3797_s6  ;;  %s2465_s26 = sshll.u32 %s3797_s6, 6 }
  0xdf   : > { %s667_s27 = scalar_lea.sflag [#allocation9], %s648_s23  ;;  %s3810_s7 = scalar_lea.vmem [#allocation8], %s2465_s26 }
  0xe0   : > { %s3808_s9 = scalar_lea.vmem [#allocation7], %s2708_s15 }
  0xe1   : > { %3331 = dma.done.wait (%p3681_p2), %s667_s27, 1040  }
  0xe2   : > { %3333 = vsyncadd (%p3681_p2), %s667_s27, 4294966256  ;;  %s684_s12 = scalar_lea.sflag [#allocation12], %s648_s23 }
  0xe3   : > { %3335 = dma.done.wait (%p3681_p2), %s684_s12, 2064  }
  0xe4   : > { %3337 = vsyncadd (%p3681_p2), %s684_s12, 4294965232  ;;  %s2466_s14 = sshll.u32 %s3797_s6, 7  ;;  %s701_s18 = scalar_lea.sflag [#allocation15], %s648_s23 }
  0xe5   : > { %s3823_s28 = scalar_lea.vmem [#allocation13], %s2466_s14  ;;  %s3825_s2 = scalar_lea.vmem [#allocation14], %s2466_s14 }
  0xe6   : > { %3339 = dma.done.wait (%p3681_p2), %s701_s18, 2064  }
  0xe7   : > { %3341 = vsyncadd (%p3681_p2), %s701_s18, 4294965232  ;;  %s4265_s5 = sld [smem:[#allocation29_spill]]  ;;  %s712_s8 = scalar_lea.vmem [#allocation16], %s3797_s6 }
  0xe8   : > { %s4266_s3 = sld [smem:[#allocation45_spill]]  ;;  %s4270_s0 = sshll.u32 %s3783_s4, 4 }
  0xe9   : > { %s4267_s22 = sld [smem:[#allocation49_spill]]  ;;  %s3856_s21 = scalar_lea.vmem [#allocation17], %s4270_s0 }
  0xea   : > { %s4268_s27 = sld [smem:[#allocation51_spill]] }
  0xeb   : > { %s4269_s10 = sld [smem:[#allocation52_spill]] }
  0xed   : > { %p805_p4 = scmp.lt.s32.totalorder %s4265_s5, 3  ;;  %p2470_p2 = scmp.ne.s32.totalorder %s4265_s5, 0 }
  0xef   : > { %s3833_s17 = scalar_select %p805_p4, %s4265_s5, 3 }
  0xf0   : > { %822 = sbr.rel (%p2470_p2) target bundleno = 247 (0xf7), region = 112 }
  0xf1   : > { %s807_s20 = scalar_lea.vmem %s4266_s3, %s3833_s17  ;;  %s2469_s24 = sshll.u32 %s3833_s17, 1 }
  0xf2   : > { %s3843_s13 = scalar_lea.vmem %s4267_s22, %s2469_s24  ;;  %s814_s12 = scalar_lea.vmem %s4268_s27, %s3833_s17 }
  0xf3   : > { %s817_s19 = scalar_lea.vmem %s4269_s10, %s3833_s17 }
  0xf5   : > { %v823_v0 = vld [vmem:[%s3789_s25] sm:$0xff]  ;;  %v824_v1 = vld [vmem:[%s3789_s25 + $0x8] sm:$0xff] }
  0xf6   : > { %825 = vst [vmem:[%s3856_s21] sm:$0xff] %v823_v0  ;;  %826 = vst [vmem:[%s3856_s21 + $0x8] sm:$0xff] %v824_v1 }
  0xf7 PF: > { %v2880_v2 = vld [vmem:[%s3800_s30 + $0xac] ss:$12 sps:$4 sm:$0xff]   ;;  %v2882_v3 = vld [vmem:[%s3800_s30 + $0xa8] ss:$12 sps:$4 sm:$0xff]   ;;  %v3405_v4 = vmov 0   ;;  %v3406_v5 = vmov 0.0   ;;  %v864_v31 = vlaneseq }
  0xf8   : > { %1039 = vmatprep.mubr.bf16.mxu0 %v3405_v4  ;;  %2615 = vmatprep.subr.bf16.mxu1 %v3406_v5  ;;  %v2883_v6 = vld [vmem:[%s3800_s30 + $0x94] ss:$12 sps:$4 sm:$0xff]   ;;  %v2885_v7 = vld [vmem:[%s3800_s30 + $0x90] ss:$12 sps:$4 sm:$0xff]   ;;  %v2888_v9 = vld [vmem:[%s3800_s30 + $0x78] ss:$12 sps:$4 sm:$0xff]  }
  0xf9   : > { %1007 = vmatprep.subr.bf16.mxu0 %v2880_v2  ;;  %v2886_v8 = vld [vmem:[%s3800_s30 + $0x7c] ss:$12 sps:$4 sm:$0xff]   ;;  %v2889_v10 = vld [vmem:[%s3800_s30 + $0x64] ss:$12 sps:$4 sm:$0xff]   ;;  %v2891_v11 = vld [vmem:[%s3800_s30 + $0x60] ss:$12 sps:$4 sm:$0xff]  }
  0xfa   : > { %1008 = vmatpush1.bf16.msra.mxu0 %v2882_v3  ;;  %v2892_v12 = vld [vmem:[%s3800_s30 + $0x4c] ss:$12 sps:$4 sm:$0xff]   ;;  %v2904_v13 = vld [vmem:[%s3800_s30 + $0xb0] ss:$12 sps:$4 sm:$0xff]   ;;  %v2894_v15 = vld [vmem:[%s3800_s30 + $0x48] ss:$12 sps:$4 sm:$0xff]  }
  0xfb   : > { %1009 = vmatprep.subr.bf16.mxu0 %v2883_v6  ;;  %2616 = vmatpush3.bf16.msra.mxu1 %v2904_v13  ;;  %v2905_v14 = vld [vmem:[%s3800_s30 + $0x98] ss:$12 sps:$4 sm:$0xff]   ;;  %v2895_v16 = vld [vmem:[%s3800_s30 + $0x34] ss:$12 sps:$4 sm:$0xff]   ;;  %v2897_v17 = vld [vmem:[%s3800_s30 + $0x30] ss:$12 sps:$4 sm:$0xff]  }
  0xfc   : > { %2617 = vmatprep.subr.bf16.mxu1 %v3406_v5  ;;  %v2898_v18 = vld [vmem:[%s3800_s30 + $0x1c] ss:$12 sps:$4 sm:$0xff]   ;;  %v2906_v19 = vld [vmem:[%s3800_s30 + $0x80] ss:$12 sps:$4 sm:$0xff]   ;;  %v2900_v21 = vld [vmem:[%s3800_s30 + $0x18] ss:$12 sps:$4 sm:$0xff]  }
  0xfd   : > { %v2907_v20 = vld [vmem:[%s3800_s30 + $0x68] ss:$12 sps:$4 sm:$0xff]   ;;  %v2901_v22 = vld [vmem:[%s3800_s30 + $0x4] ss:$12 sps:$4 sm:$0xff]   ;;  %v2903_v24 = vld [vmem:[%s3800_s30] ss:$12 sps:$4 sm:$0xff]  }
  0xfe   : > { %1010 = vmatpush1.bf16.msra.mxu0 %v2885_v7  ;;  %v2908_v23 = vld [vmem:[%s3800_s30 + $0x50] ss:$12 sps:$4 sm:$0xff]   ;;  %v3893_v26 = vld [vmem:[%s3856_s21 + $0x8] sm:$0xff]  ;;  %v2910_v29 = vld [vmem:[%s3800_s30 + $0x20] ss:$12 sps:$4 sm:$0xff]   ;;  %vm3407_vm0 = vmmov 0  }
  0xff   : > { %1011 = vmatprep.subr.bf16.mxu0 %v2886_v8  ;;  %2618 = vmatpush3.bf16.msra.mxu1 %v2905_v14  ;;  %v3890_v25 = vld [vmem:[%s3856_s21] sm:$0xff]  ;;  %v2909_v27 = vld [vmem:[%s3800_s30 + $0x38] ss:$12 sps:$4 sm:$0xff]   ;;  %v2911_v30 = vld [vmem:[%s3800_s30 + $0x8] ss:$12 sps:$4 sm:$0xff]   ;;  %v3912_v32 = vshrl.u32 %v864_v31, 7 }
 0x100   : > { %2619 = vmatprep.subr.bf16.mxu1 %v3406_v5  ;;  %v829_v28 = vpack.c.bf16 %v3893_v26, %v3890_v25  ;;  %2631 = vmatprep.mubr.msk.bf16.mxu1 %vm3407_vm0, %v3406_v5  ;;  %v862_v35 = vld [vmem:[%s3808_s9] sm:$0x7]  ;;  %vm1094_vm1 = vcmask 261120   ;;  %vm1142_vm2 = vcmask 130048   ;;  %s3408_s25 = smov 96   ;;  %s3409_s30 = smov 32  }
 0x101   : > { %v870_v33 = vsub.s32 1, %v3912_v32  ;;  %v866_v40 = vsub.s32 0, %v3912_v32  ;;  %v874_v49 = vsub.s32 2, %v3912_v32  ;;  %s3410_s9 = smov 64   ;;  %vm1602_vm3 = vcmask 523264   ;;  %s4273_s3 = scalar_lea.vmem [#allocation11], %s3797_s6 }
 0x102   : > { %1012 = vmatpush1.bf16.msra.mxu0 %v2888_v9  ;;  %vm1605_vm4 = vcmask 785408   ;;  %v2530_v32 = vld [vmem:[%s814_s12] ss:$0 sm:$0xff]  ;;  %s4275_s23 = sld [smem:[#allocation30_spill]]  ;;  %s2156_s27 = sshll.u32 %s3856_s21, 4  ;;  %s4091_s27 = int_to_ptr.vmem [resolvable:$true] %s2156_s27 }
 0x103   : > { %1013 = vmatprep.subr.bf16.mxu0 %v2889_v10  ;;  %2620 = vmatpush3.bf16.msra.mxu1 %v2906_v19  ;;  %v871_v37 = vrot.slane %v862_v35, %v870_v33  ;;  %v867_v44 = vrot.slane %v862_v35, %v866_v40  ;;  %v875_v50 = vrot.slane %v862_v35, %v874_v49  ;;  %s4277_s15 = sld [smem:[#allocation39_spill]] }
 0x104   : > { %2621 = vmatprep.subr.bf16.mxu1 %v3406_v5  ;;  %s4278_s18 = sld [smem:[#allocation54_spill]] }
 0x106   : > { %1014 = vmatpush1.bf16.msra.mxu0 %v2891_v11 }
 0x107   : > { %1015 = vmatprep.subr.bf16.mxu0 %v2892_v12  ;;  %2622 = vmatpush3.bf16.msra.mxu1 %v2907_v20 }
 0x108   : > { %2623 = vmatprep.subr.bf16.mxu1 %v3406_v5  ;;  %s2558_s26 = sshll.u32 %s4275_s23, 8 }
 0x109   : > { %p4280_p8 = scmp.ne.s32.totalorder %s4277_s15, 0 }
 0x10a   : > { %1016 = vmatpush1.bf16.msra.mxu0 %v2894_v15  ;;  %s4279_s0 = smov %s4278_s18 }
 0x10b   : > { %1017 = vmatprep.subr.bf16.mxu0 %v2895_v16  ;;  %2624 = vmatpush3.bf16.msra.mxu1 %v2908_v23 }
 0x10c   : > { %2625 = vmatprep.subr.bf16.mxu1 %v3406_v5 }
 0x10e   : > { %1018 = vmatpush1.bf16.msra.mxu0 %v2897_v17 }
 0x10f   : > { %1019 = vmatprep.subr.bf16.mxu0 %v2898_v18  ;;  %2626 = vmatpush3.bf16.msra.mxu1 %v2909_v27 }
 0x110   : > { %2627 = vmatprep.subr.bf16.mxu1 %v3406_v5 }
 0x112   : > { %1020 = vmatpush1.bf16.msra.mxu0 %v2900_v21 }
 0x113   : > { %1021 = vmatprep.subr.bf16.mxu0 %v2901_v22  ;;  %2628 = vmatpush3.bf16.msra.mxu1 %v2910_v29 }
 0x114   : > { %2629 = vmatprep.subr.bf16.mxu1 %v3406_v5 }
 0x116   : > { %1022 = vmatpush1.bf16.msra.mxu0 %v2903_v24 }
 0x117   : > { %2659 = vmatprep.subr.bf16.mxu0 %v3406_v5  ;;  %2630 = vmatpush3.bf16.msra.mxu1 %v2911_v30 }
 0x118   : > { %2635 = vmatprep.subr.bf16.mxu1 %v3406_v5 }
 0x119   : > { %1040 = vmatmul.mubr.bf16.vlgmr.msra.gmra.mxu0 %v829_v28 }
 0x11a   : > { %2661 = vmatprep.mubr.msk.bf16.mxu0 %vm3407_vm0, %v3406_v5  ;;  %2632 = vmatmul.mubr.bf16.vlgmr.msra.gmra.mxu1 %v829_v28 }
 0x11b   : > { %2637 = vmatprep.mubr.msk.bf16.mxu1 %vm3407_vm0, %v3406_v5 }
 0x1d9   : > { %v1041_v34 = vpop.f32.mrf.mxu0 }
 0x1da   : > { %v1042_v47 = vadd.f32 %v1041_v34, %v867_v44  ;;  %v1084_v51 = vpop.f32.mrf.mxu1 }
 0x1db   : > { %v1043_v36 = vpop.f32.mrf.mxu0  ;;  %v1085_v53 = vadd.f32 %v1084_v51, %v875_v50 }
 0x1dc   : > { %v1044_v41 = vadd.f32 %v1043_v36, %v871_v37  ;;  %v2633_v52 = vpop.f32.mrf.mxu1 }
 0x1dd   : > { %v1045_v38 = vpop.f32.mrf.mxu0 }
 0x1de   : > { %v1046_v46 = vadd.f32 %v1045_v38, %v867_v44  ;;  %v1087_v54 = vpop.f32.mrf.mxu1 }
 0x1df   : > { %v1047_v39 = vpop.f32.mrf.mxu0  ;;  %v1088_v55 = vadd.f32 %v1087_v54, %v875_v50 }
 0x1e0   : > { %v1048_v42 = vadd.f32 %v1047_v39, %v871_v37  ;;  %v1091_v48 = vpack.c.bf16 %v1046_v46, %v1042_v47  ;;  %v2634_v56 = vpop.f32.mrf.mxu1 }
 0x1e1   : > { %v3927_v57 = vpack.c.bf16 %v1088_v55, %v1085_v53 }
 0x1e2   : > { %v1092_v43 = vpack.c.bf16 %v1048_v42, %v1044_v41 }
 0x1e4   : > { %v1099_v45 = vsel %vm1094_vm1, %v1092_v43, 0 }
 0x1e5   : > { %2636 = vmatpush3.bf16.xpose.msra.mxu1 %v1099_v45 }
 0x1e6   : > { %2641 = vmatprep.subr.bf16.mxu1 %v3406_v5 }
 0x1ec   : > { %2638 = vmatmul.mubr.msk.bf16.vlgmr.msra.gmra.mxu1 %vm1094_vm1, %v1091_v48 }
 0x1ed   : > { %2643 = vmatprep.mubr.msk.bf16.mxu1 %vm3407_vm0, %v3406_v5  ;;  %2642 = vmatpush3.bf16.msra.mxu1 %v3927_v57 }
 0x1ee   : > { %2647 = vmatprep.subr.bf16.mxu1 %v3406_v5 }
 0x2ac   : > { %v1135_v58 = vpop.f32.mrf.mxu1 }
 0x2ad   : > { %v1143_v59 = vsel %vm1142_vm2, %v1135_v58, -inf }
 0x2ae   : > { %1144 = vmax.xlane.f32.xlu0 %v1143_v59  ;;  %v2639_v60 = vpop.f32.mrf.mxu1 }
 0x2b0   : > { %v1138_v61 = vpop.f32.mrf.mxu1 }
 0x2b1   : > { %v1146_v62 = vsel %vm1142_vm2, %v1138_v61, -inf }
 0x2b2   : > { %1147 = vmax.xlane.f32.xlu0 %v1146_v62  ;;  %v2640_v63 = vpop.f32.mrf.mxu1 }
 0x2c8   : > { %1214 = vrot.lane.b32.xlu0 %v1092_v43, %s3408_s25 }
 0x2cc   : > { %1457 = vrot.lane.b32.xlu0 %v1092_v43, %s3409_s30 }
 0x337   : > { %v1145_v0 = vpop.xlane.xlu0 %1144 }
 0x338   : > { %v1149_v1 = vsub.f32 %v1135_v58, %v1145_v0 }
 0x33a   : > { %v1151_v2 = vmul.f32 1.442695, %v1149_v1 }
 0x33b   : > { %v1148_v3 = vpop.xlane.xlu0 %1147 }
 0x33c   : > { %2960 = vpow2.f32 %v1151_v2  ;;  %v1150_v6 = vsub.f32 %v1138_v61, %v1148_v3 }
 0x33e   : > { %v1153_v7 = vmul.f32 1.442695, %v1150_v6 }
 0x33f   : > { %v1215_v15 = vpop.permute.xlu0 %1214 }
 0x340   : > { %2962 = vpow2.f32 %v1153_v7  ;;  %v1220_v28 = vsel %vm1094_vm1, %v1215_v15, 0 }
 0x343   : > { %v1458_v20 = vpop.permute.xlu0 %1457 }
 0x344   : > { %v1463_v24 = vsel %vm1094_vm1, %v1458_v20, 0 }
 0x349   : > { %v2961_v8 = vpop.eup %2960 }
 0x34a   : > { %v1155_v9 = vsel %vm1142_vm2, %v2961_v8, 0.0 }
 0x34b   : > { %1156 = vadd.xlane.f32.xlu1 %v1155_v9 }
 0x34d   : > { %v2963_v10 = vpop.eup %2962 }
 0x34e   : > { %v1158_v11 = vsel %vm1142_vm2, %v2963_v10, 0.0 }
 0x34f   : > { %1159 = vadd.xlane.f32.xlu1 %v1158_v11 }
 0x360   : > { %1211 = vrot.lane.b32.xlu1 %v1091_v48, %s3408_s25 }
 0x364   : > { %1336 = vrot.lane.b32.xlu1 %v1092_v43, %s3410_s9 }
 0x368   : > { %1334 = vrot.lane.b32.xlu1 %v1091_v48, %s3410_s9 }
 0x36c   : > { %1455 = vrot.lane.b32.xlu1 %v1091_v48, %s3409_s30 }
 0x3d4   : > { %v1157_v12 = vpop.xlane.xlu1 %1156 }
 0x3d5   : > { %2964 = vrcp.f32 %v1157_v12 }
 0x3d8   : > { %v1160_v13 = vpop.xlane.xlu1 %1159 }
 0x3d9   : > { %2966 = vrcp.f32 %v1160_v13 }
 0x3dc   : > { %v1212_v14 = vpop.permute.xlu1 %1211 }
 0x3e0   : > { %v1337_v16 = vpop.permute.xlu1 %1336 }
 0x3e1   : > { %v1342_v17 = vsel %vm1094_vm1, %v1337_v16, 0 }
 0x3e2   : > { %2660 = vmatpush3.bf16.xpose.msra.mxu0 %v1342_v17  ;;  %v2965_v18 = vpop.eup %2964 }
 0x3e3   : > { %2671 = vmatprep.subr.bf16.mxu0 %v3406_v5  ;;  %v1163_v21 = vmul.f32 %v2965_v18, %v2961_v8 }
 0x3e4   : > { %v1335_v23 = vpop.permute.xlu1 %1334 }
 0x3e6   : > { %v2967_v19 = vpop.eup %2966 }
 0x3e7   : > { %v1164_v22 = vmul.f32 %v2967_v19, %v2963_v10 }
 0x3e8   : > { %v1456_v29 = vpop.permute.xlu1 %1455 }
 0x3e9   : > { %2662 = vmatmul.mubr.msk.bf16.vlgmr.msra.gmra.mxu0 %vm1094_vm1, %v1335_v23  ;;  %v1165_v27 = vpack.c.bf16 %v1164_v22, %v1163_v21 }
 0x3ea   : > { %2672 = vmatpush3.bf16.xpose.msra.mxu0 %v1463_v24  ;;  %2673 = vmatprep.mubr.msk.bf16.mxu0 %vm3407_vm0, %v3406_v5 }
 0x3eb   : > { %2644 = vmatmul.mubr.msk.bf16.vlgmr.msra.gmra.mxu1 %vm1142_vm2, %v1165_v27  ;;  %2683 = vmatprep.subr.bf16.mxu0 %v3406_v5 }
 0x3ec   : > { %2648 = vmatpush3.bf16.xpose.msra.mxu1 %v1220_v28  ;;  %2649 = vmatprep.mubr.msk.bf16.mxu1 %vm3407_vm0, %v3406_v5 }
 0x3ed   : > { %2653 = vmatprep.subr.bf16.mxu1 %v3406_v5 }
 0x3f1   : > { %2674 = vmatmul.mubr.msk.bf16.vlgmr.msra.gmra.mxu0 %vm1094_vm1, %v1456_v29 }
 0x3f2   : > { %2699 = vmatprep.mubr.msk.bf16.mxu0 %vm3407_vm0, %v3406_v5 }
 0x3f3   : > { %2650 = vmatmul.mubr.msk.bf16.vlgmr.msra.gmra.mxu1 %vm1094_vm1, %v1212_v14 }
 0x3f4   : > { %2655 = vmatprep.mubr.msk.bf16.mxu1 %vm3407_vm0, %v3406_v5 }
 0x4a9   : > { %v1378_v30 = vpop.f32.mrf.mxu0 }
 0x4aa   : > { %v1385_v49 = vsel %vm1142_vm2, %v1378_v30, -inf }
 0x4ab   : > { %v3959_v31 = vpop.f32.mrf.mxu1  ;;  %v2663_v34 = vpop.f32.mrf.mxu0 }
 0x4ad   : > { %v2645_v35 = vpop.f32.mrf.mxu1  ;;  %v1381_v36 = vpop.f32.mrf.mxu0 }
 0x4ae   : > { %v1388_v52 = vsel %vm1142_vm2, %v1381_v36, -inf }
 0x4af   : > { %v3961_v37 = vpop.f32.mrf.mxu1  ;;  %v2664_v38 = vpop.f32.mrf.mxu0 }
 0x4b1   : > { %v2646_v39 = vpop.f32.mrf.mxu1  ;;  %v1499_v41 = vpop.f32.mrf.mxu0 }
 0x4b2   : > { %v1506_v54 = vsel %vm1142_vm2, %v1499_v41, -inf }
 0x4b3   : > { %v1256_v42 = vpop.f32.mrf.mxu1  ;;  %v2675_v43 = vpop.f32.mrf.mxu0 }
 0x4b4   : > { %v1263_v44 = vsel %vm1142_vm2, %v1256_v42, -inf }
 0x4b5   : > { %v1502_v45 = vpop.f32.mrf.mxu0  ;;  %1264 = vmax.xlane.f32.xlu0 %v1263_v44  ;;  %v2651_v46 = vpop.f32.mrf.mxu1 }
 0x4b6   : > { %v1509_v53 = vsel %vm1142_vm2, %v1502_v45, -inf }
 0x4b7   : > { %v1259_v47 = vpop.f32.mrf.mxu1  ;;  %v2676_v48 = vpop.f32.mrf.mxu0 }
 0x4b8   : > { %v1266_v50 = vsel %vm1142_vm2, %v1259_v47, -inf }
 0x4b9   : > { %1386 = vmax.xlane.f32.xlu0 %v1385_v49  ;;  %1267 = vmax.xlane.f32.xlu1 %v1266_v50  ;;  %v2652_v51 = vpop.f32.mrf.mxu1 }
 0x4bd   : > { %1389 = vmax.xlane.f32.xlu0 %v1388_v52  ;;  %1510 = vmax.xlane.f32.xlu1 %v1509_v53 }
 0x4c1   : > { %1507 = vmax.xlane.f32.xlu0 %v1506_v54  ;;  %v2912_v54 = vld [vmem:[%s3810_s7 + $0x38] sm:$0xff]  }
 0x4c2   : > { %2684 = vmatpush3.bf16.msra.mxu0 %v2912_v54  ;;  %v2926_v54 = vld [vmem:[%s3823_s28 + $0x50] ss:$8 sps:$4 sm:$0xff]  }
 0x4c3   : > { %2685 = vmatprep.subr.bf16.mxu0 %v3406_v5 }
 0x53e   : > { %v1265_v55 = vpop.xlane.xlu0 %1264 }
 0x53f   : > { %v1269_v1 = vsub.f32 %v1256_v42, %v1265_v55  ;;  %v2913_v55 = vld [vmem:[%s3810_s7 + $0x30] sm:$0xff]  }
 0x540   : > { %2686 = vmatpush3.bf16.msra.mxu0 %v2913_v55  ;;  %v2929_v55 = vld [vmem:[%s3823_s28 + $0x40] ss:$8 sps:$4 sm:$0xff]  }
 0x541   : > { %v1271_v9 = vmul.f32 1.442695, %v1269_v1  ;;  %2687 = vmatprep.subr.bf16.mxu0 %v3406_v5 }
 0x542   : > { %v1387_v56 = vpop.xlane.xlu0 %1386  ;;  %v1268_v58 = vpop.xlane.xlu1 %1267 }
 0x543   : > { %v1391_v59 = vsub.f32 %v1378_v30, %v1387_v56  ;;  %v1270_v2 = vsub.f32 %v1259_v47, %v1268_v58  ;;  %v2914_v56 = vld [vmem:[%s3810_s7 + $0x28] sm:$0xff]   ;;  %v2915_v58 = vld [vmem:[%s3810_s7 + $0x20] sm:$0xff]  }
 0x544   : > { %2688 = vmatpush3.bf16.msra.mxu0 %v2914_v56  ;;  %v2931_v56 = vld [vmem:[%s3823_s28 + $0x44] ss:$8 sps:$4 sm:$0xff]  }
 0x545   : > { %v1393_v60 = vmul.f32 1.442695, %v1391_v59  ;;  %v1273_v10 = vmul.f32 1.442695, %v1270_v2  ;;  %2689 = vmatprep.subr.bf16.mxu0 %v3406_v5  ;;  %v2916_v59 = vld [vmem:[%s3810_s7 + $0x18] sm:$0xff]  }
 0x546   : > { %v1390_v61 = vpop.xlane.xlu0 %1389  ;;  %v1511_v62 = vpop.xlane.xlu1 %1510 }
 0x547   : > { %2968 = vpow2.f32 %v1393_v60  ;;  %v1392_v63 = vsub.f32 %v1381_v36, %v1390_v61  ;;  %v1513_v0 = vsub.f32 %v1502_v45, %v1511_v62  ;;  %v2917_v61 = vld [vmem:[%s3810_s7 + $0x10] sm:$0xff]  }
 0x548   : > { %2690 = vmatpush3.bf16.msra.mxu0 %v2915_v58  ;;  %v2934_v58 = vld [vmem:[%s3823_s28 + $0x34] ss:$8 sps:$4 sm:$0xff]  }
 0x549   : > { %v1395_v3 = vmul.f32 1.442695, %v1392_v63  ;;  %v1516_v6 = vmul.f32 1.442695, %v1513_v0  ;;  %2691 = vmatprep.subr.bf16.mxu0 %v3406_v5  ;;  %v2918_v0 = vld [vmem:[%s3810_s7 + $0x8] sm:$0xff]  }
 0x54a   : > { %v1508_v7 = vpop.xlane.xlu0 %1507 }
 0x54b   : > { %2970 = vpow2.f32 %v1395_v3  ;;  %v1512_v8 = vsub.f32 %v1499_v41, %v1508_v7 }
 0x54c   : > { %2972 = vpow2.f32 %v1516_v6  ;;  %2692 = vmatpush3.bf16.msra.mxu0 %v2916_v59  ;;  %v2919_v6 = vld [vmem:[%s3810_s7] sm:$0xff]   ;;  %v2932_v59 = vld [vmem:[%s3823_s28 + $0x30] ss:$8 sps:$4 sm:$0xff]  }
 0x54d   : > { %v1514_v11 = vmul.f32 1.442695, %v1512_v8  ;;  %2693 = vmatprep.subr.bf16.mxu0 %v3406_v5 }
 0x54f   : > { %2974 = vpow2.f32 %v1514_v11 }
 0x550   : > { %2976 = vpow2.f32 %v1271_v9  ;;  %2694 = vmatpush3.bf16.msra.mxu0 %v2917_v61  ;;  %v2940_v61 = vld [vmem:[%s3823_s28 + $0x14] ss:$8 sps:$4 sm:$0xff]  }
 0x551   : > { %2978 = vpow2.f32 %v1273_v10  ;;  %2695 = vmatprep.subr.bf16.mxu0 %v3406_v5 }
 0x554   : > { %v2969_v12 = vpop.eup %2968  ;;  %2696 = vmatpush3.bf16.msra.mxu0 %v2918_v0  ;;  %v2941_v0 = vld [vmem:[%s3823_s28] ss:$8 sps:$4 sm:$0xff]  }
 0x555   : > { %v1397_v13 = vsel %vm1142_vm2, %v2969_v12, 0.0  ;;  %2697 = vmatprep.subr.bf16.mxu0 %v3406_v5 }
 0x556   : > { %1398 = vadd.xlane.f32.xlu0 %v1397_v13 }
 0x558   : > { %v2971_v14 = vpop.eup %2970  ;;  %2698 = vmatpush3.bf16.msra.mxu0 %v2919_v6  ;;  %v2947_v6 = vld [vmem:[%s3825_s2 + $0x30] sm:$0xff]  }
 0x559   : > { %v1400_v15 = vsel %vm1142_vm2, %v2971_v14, 0.0  ;;  %v2973_v16 = vpop.eup %2972 }
 0x55a   : > { %1401 = vadd.xlane.f32.xlu1 %v1400_v15  ;;  %v1521_v20 = vsel %vm1142_vm2, %v2973_v16, 0.0 }
 0x55c   : > { %v2975_v17 = vpop.eup %2974 }
 0x55d   : > { %v2977_v18 = vpop.eup %2976  ;;  %v1518_v19 = vsel %vm1142_vm2, %v2975_v17, 0.0 }
 0x55e   : > { %v2979_v21 = vpop.eup %2978  ;;  %1519 = vadd.xlane.f32.xlu0 %v1518_v19  ;;  %1522 = vadd.xlane.f32.xlu1 %v1521_v20  ;;  %v1275_v22 = vsel %vm1142_vm2, %v2977_v18, 0.0 }
 0x55f   : > { %v1278_v23 = vsel %vm1142_vm2, %v2979_v21, 0.0 }
 0x562   : > { %1276 = vadd.xlane.f32.xlu0 %v1275_v22  ;;  %1279 = vadd.xlane.f32.xlu1 %v1278_v23 }
 0x573   : > { %1408 = vrot.lane.b32.xlu1 %v3927_v57, %s3410_s9 }
 0x577   : > { %1529 = vrot.lane.b32.xlu1 %v3927_v57, %s3409_s30 }
 0x578   : > { %1287 = vrot.lane.b32.xlu0 %v3927_v57, %s3408_s25 }
 0x5df   : > { %v1399_v24 = vpop.xlane.xlu0 %1398 }
 0x5e3   : > { %v1402_v27 = vpop.xlane.xlu1 %1401 }
 0x5e7   : > { %v1520_v28 = vpop.xlane.xlu0 %1519  ;;  %v1523_v29 = vpop.xlane.xlu1 %1522 }
 0x5eb   : > { %v1277_v30 = vpop.xlane.xlu0 %1276  ;;  %v1280_v34 = vpop.xlane.xlu1 %1279 }
 0x5ec   : > { %2980 = vrcp.f32 %v1277_v30 }
 0x5ed   : > { %2982 = vrcp.f32 %v1280_v34 }
 0x5ee   : > { %2984 = vrcp.f32 %v1402_v27 }
 0x5ef   : > { %v1288_v35 = vpop.permute.xlu0 %1287  ;;  %2986 = vrcp.f32 %v1399_v24  ;;  %v1409_v43 = vpop.permute.xlu1 %1408 }
 0x5f0   : > { %2654 = vmatpush3.bf16.msra.mxu1 %v1288_v35  ;;  %2988 = vrcp.f32 %v1520_v28  ;;  %v2503_v35 = vld [vmem:[%s807_s20] ss:$0 sm:$0xff] }
 0x5f1   : > { %2665 = vmatprep.subr.bf16.mxu1 %v3406_v5  ;;  %2990 = vrcp.f32 %v1523_v29 }
 0x5f3   : > { %v1530_v50 = vpop.permute.xlu1 %1529 }
 0x5f9   : > { %v2981_v36 = vpop.eup %2980 }
 0x5fa   : > { %v2983_v38 = vpop.eup %2982  ;;  %v1283_v39 = vmul.f32 %v2981_v36, %v2977_v18 }
 0x5fb   : > { %v1284_v57 = vmul.f32 %v2983_v38, %v2979_v21  ;;  %v2985_v42 = vpop.eup %2984 }
 0x5fc   : > { %v2987_v44 = vpop.eup %2986  ;;  %v1406_v45 = vmul.f32 %v2985_v42, %v2971_v14 }
 0x5fd   : > { %v1285_v41 = vpack.c.bf16 %v1284_v57, %v1283_v39  ;;  %v1405_v46 = vmul.f32 %v2987_v44, %v2969_v12  ;;  %v2989_v47 = vpop.eup %2988  ;;  %v2922_v44 = vld [vmem:[%s3823_s28 + $0x74] ss:$8 sps:$4 sm:$0xff]  }
 0x5fe   : > { %v2991_v49 = vpop.eup %2990  ;;  %v1526_v51 = vmul.f32 %v2989_v47, %v2975_v17 }
 0x5ff   : > { %2656 = vmatmul.mubr.msk.bf16.vlgmr.msra.gmra.mxu1 %vm1142_vm2, %v1285_v41  ;;  %v1407_v48 = vpack.c.bf16 %v1406_v45, %v1405_v46  ;;  %v1527_v52 = vmul.f32 %v2991_v49, %v2973_v16 }
 0x600   : > { %2666 = vmatpush3.bf16.msra.mxu1 %v1409_v43  ;;  %2667 = vmatprep.mubr.msk.bf16.mxu1 %vm3407_vm0, %v3406_v5  ;;  %v2920_v43 = vld [vmem:[%s3823_s28 + $0x70] ss:$8 sps:$4 sm:$0xff]  }
 0x601   : > { %2677 = vmatprep.subr.bf16.mxu1 %v3406_v5  ;;  %v1528_v53 = vpack.c.bf16 %v1527_v52, %v1526_v51  ;;  %v2925_v51 = vld [vmem:[%s3823_s28 + $0x64] ss:$8 sps:$4 sm:$0xff]   ;;  %v2923_v52 = vld [vmem:[%s3823_s28 + $0x60] ss:$8 sps:$4 sm:$0xff]  }
 0x607   : > { %2668 = vmatmul.mubr.msk.bf16.vlgmr.msra.gmra.mxu1 %vm1142_vm2, %v1407_v48 }
 0x608   : > { %2678 = vmatpush3.bf16.msra.mxu1 %v1530_v50  ;;  %2679 = vmatprep.mubr.msk.bf16.mxu1 %vm3407_vm0, %v3406_v5 }
 0x609   : > { %1873 = vmatprep.subr.bf16.mxu1 %v2922_v44 }
 0x60f   : > { %2680 = vmatmul.mubr.msk.bf16.vlgmr.msra.gmra.mxu1 %vm1142_vm2, %v1528_v53  ;;  %v2928_v53 = vld [vmem:[%s3823_s28 + $0x54] ss:$8 sps:$4 sm:$0xff]  }
 0x610   : > { %1905 = vmatprep.mubr.bf16.mxu1 %v3405_v4  ;;  %1874 = vmatpush1.bf16.msra.mxu1 %v2920_v43 }
 0x611   : > { %1875 = vmatprep.subr.bf16.mxu1 %v2925_v51 }
 0x614   : > { %1876 = vmatpush1.bf16.msra.mxu1 %v2923_v52 }
 0x615   : > { %1877 = vmatprep.subr.bf16.mxu1 %v2928_v53 }
 0x618   : > { %1878 = vmatpush1.bf16.msra.mxu1 %v2926_v54 }
 0x619   : > { %1879 = vmatprep.subr.bf16.mxu1 %v2931_v56 }
 0x61c   : > { %1880 = vmatpush1.bf16.msra.mxu1 %v2929_v55 }
 0x61d   : > { %1881 = vmatprep.subr.bf16.mxu1 %v2934_v58 }
 0x620   : > { %1882 = vmatpush1.bf16.msra.mxu1 %v2932_v59 }
 0x6bf   : > { %v1327_v4 = vpop.f32.mrf.mxu1 }
 0x6c1   : > { %v2657_v60 = vpop.f32.mrf.mxu1 }
 0x6c2   : > { %v2935_v60 = vld [vmem:[%s3823_s28 + $0x20] ss:$8 sps:$4 sm:$0xff]  }
 0x6c3   : > { %v1330_v62 = vpop.f32.mrf.mxu1 }
 0x6c4   : > { %v2865_v63 = vpack.i.bf16 %v1330_v62, %v1327_v4  ;;  %v2937_v4 = vld [vmem:[%s3823_s28 + $0x24] ss:$8 sps:$4 sm:$0xff]   ;;  %v2938_v62 = vld [vmem:[%s3823_s28 + $0x10] ss:$8 sps:$4 sm:$0xff]  }
 0x6c5   : > { %v2658_v1 = vpop.f32.mrf.mxu1  ;;  %1883 = vmatprep.subr.bf16.mxu1 %v2937_v4 }
 0x6c6   : > { %2866 = vrot.lane.b32.xlu1 %v2865_v63, %s3409_s30  ;;  %1884 = vmatpush1.bf16.msra.mxu1 %v2935_v60  ;;  %v2943_v63 = vld [vmem:[%s3823_s28 + $0x4] ss:$8 sps:$4 sm:$0xff]   ;;  %v2944_v1 = vld [vmem:[%s3825_s2 + $0x78] sm:$0xff]   ;;  %s4272_s28 = scalar_lea.vmem [#allocation10], %s3797_s6  ;;  %s3252_s6 = scalar_lea.vmem %s4091_s27, 256 }
 0x6c7   : > { %v1448_v2 = vpop.f32.mrf.mxu1  ;;  %1885 = vmatprep.subr.bf16.mxu1 %v2940_v61  ;;  %2593 = vmatprep.subr.bf16.mxu0 %v2944_v1  ;;  %p3253_p3 = scmp.ne.s32.totalorder %s4091_s27, %s3252_s6 }
 0x6c9   : > { %v2669_v3 = vpop.f32.mrf.mxu1  ;;  %p3254_p12 = pnand %p3253_p3, %p4280_p8 }
 0x6ca   : > { %1886 = vmatpush1.bf16.msra.mxu1 %v2938_v62  ;;  %v2946_v3 = vld [vmem:[%s3825_s2 + $0x70] sm:$0xff]  }
 0x6cb   : > { %v1451_v7 = vpop.f32.mrf.mxu1  ;;  %1887 = vmatprep.subr.bf16.mxu1 %v2943_v63  ;;  %p3255_p7 = pneg %p3254_p12 }
 0x6cc   : > { %v2870_v8 = vpack.i.bf16 %v1451_v7, %v1448_v2  ;;  %v2945_v2 = vld [vmem:[%s3825_s2 + $0x38] sm:$0xff]   ;;  %v2948_v7 = vld [vmem:[%s3825_s2 + $0x68] sm:$0xff]  }
 0x6cd   : > { %v2670_v9 = vpop.f32.mrf.mxu1 }
 0x6ce   : > { %2871 = vrot.lane.b32.xlu0 %v2870_v8, %s3410_s9  ;;  %1888 = vmatpush1.bf16.msra.mxu1 %v2941_v0  ;;  %v2949_v8 = vld [vmem:[%s3825_s2 + $0x28] sm:$0xff]   ;;  %v2950_v9 = vld [vmem:[%s3825_s2 + $0x60] sm:$0xff]  }
 0x6cf   : > { %v1569_v10 = vpop.f32.mrf.mxu1 }
 0x6d1   : > { %v2681_v11 = vpop.f32.mrf.mxu1 }
 0x6d2   : > { %v2952_v11 = vld [vmem:[%s3825_s2 + $0x58] sm:$0xff]  }
 0x6d3   : > { %v1572_v12 = vpop.f32.mrf.mxu1 }
 0x6d4   : > { %v2875_v13 = vpack.i.bf16 %v1572_v12, %v1569_v10  ;;  %v2951_v10 = vld [vmem:[%s3825_s2 + $0x20] sm:$0xff]   ;;  %v2953_v12 = vld [vmem:[%s3825_s2 + $0x18] sm:$0xff]  }
 0x6d5   : > { %v2682_v14 = vpop.f32.mrf.mxu1 }
 0x6d6   : > { %2876 = vrot.lane.b32.xlu1 %v2875_v13, %s3408_s25  ;;  %s4089_s25 = scalar_lea.hbm %s4278_s18, %s2558_s26 }
 0x738   : > { %v2867_v15 = vpop.permute.xlu1 %2866 }
 0x739   : > { %v2869_v17 = vunpack.i.h.bf16 %v2867_v15  ;;  %v2868_v18 = vunpack.i.l.bf16 %v2867_v15 }
 0x73b   : > { %v1601_v21 = vsel %vm1094_vm1, %v3961_v37, %v2869_v17  ;;  %v1600_v22 = vsel %vm1094_vm1, %v3959_v31, %v2868_v18 }
 0x740   : > { %v2872_v16 = vpop.permute.xlu0 %2871 }
 0x741   : > { %v2874_v5 = vunpack.i.h.bf16 %v2872_v16  ;;  %v2873_v19 = vunpack.i.l.bf16 %v2872_v16 }
 0x743   : > { %v1604_v27 = vsel %vm1602_vm3, %v1601_v21, %v2874_v5  ;;  %v1603_v28 = vsel %vm1602_vm3, %v1600_v22, %v2873_v19 }
 0x748   : > { %v2877_v20 = vpop.permute.xlu1 %2876 }
 0x749   : > { %v2879_v23 = vunpack.i.h.bf16 %v2877_v20  ;;  %v2878_v24 = vunpack.i.l.bf16 %v2877_v20  ;;  %v2512_v20 = vld [vmem:[%s4272_s28] ss:$0 sm:$0xff] }
 0x74b   : > { %v1607_v29 = vsel %vm1605_vm4, %v1604_v27, %v2879_v23  ;;  %v1606_v30 = vsel %vm1605_vm4, %v1603_v28, %v2878_v24  ;;  %v2513_v24 = vld [vmem:[%s4273_s3] ss:$0 sm:$0xff] }
 0x74c   : > { %v1608_v34 = vpack.c.bf16 %v1607_v29, %v1606_v30 }
 0x74e   : > { %2700 = vmatmul.mubr.bf16.vlgmr.msra.gmra.mxu0 %v1608_v34  ;;  %v2954_v34 = vld [vmem:[%s3825_s2 + $0x50] sm:$0xff]  }
 0x74f   : > { %2594 = vmatpush3.bf16.msra.mxu0 %v2945_v2 }
 0x750   : > { %2595 = vmatprep.subr.bf16.mxu0 %v2946_v3 }
 0x753   : > { %2596 = vmatpush3.bf16.msra.mxu0 %v2947_v6 }
 0x754   : > { %2597 = vmatprep.subr.bf16.mxu0 %v2948_v7 }
 0x757   : > { %2598 = vmatpush3.bf16.msra.mxu0 %v2949_v8 }
 0x758   : > { %2599 = vmatprep.subr.bf16.mxu0 %v2950_v9 }
 0x75b   : > { %2600 = vmatpush3.bf16.msra.mxu0 %v2951_v10 }
 0x75c   : > { %2601 = vmatprep.subr.bf16.mxu0 %v2952_v11 }
 0x75f   : > { %2602 = vmatpush3.bf16.msra.mxu0 %v2953_v12 }
 0x760   : > { %2603 = vmatprep.subr.bf16.mxu0 %v2954_v34 }
 0x80e   : > { %v1714_v36 = vpop.f32.mrf.mxu0 }
 0x80f   : > { %v1715_v37 = vadd.f32 %v2503_v35, %v1714_v36  ;;  %v2956_v36 = vld [vmem:[%s3825_s2 + $0x48] sm:$0xff]  }
 0x810   : > { %v2701_v38 = vpop.f32.mrf.mxu0 }
 0x811   : > { %v1721_v31 = vadd.f32 %v1715_v37, %v3890_v25  ;;  %v2957_v37 = vld [vmem:[%s3825_s2 + $0x8] sm:$0xff]   ;;  %v2958_v38 = vld [vmem:[%s3825_s2 + $0x40] sm:$0xff]  }
 0x812   : > { %v1717_v39 = vpop.f32.mrf.mxu0 }
 0x813   : > { %v1718_v57 = vadd.f32 %v2503_v35, %v1717_v39  ;;  %1723 = vadd.xlane.f32.xlu0 %v1721_v31  ;;  %v2955_v35 = vld [vmem:[%s3825_s2 + $0x10] sm:$0xff]  }
 0x814   : > { %v2702_v41 = vpop.f32.mrf.mxu0  ;;  %2604 = vmatpush3.bf16.msra.mxu0 %v2955_v35  ;;  %v1781_v39 = vld [vmem:[%s3843_s13] sm:$0x3] }
 0x815   : > { %v1722_v42 = vadd.f32 %v1718_v57, %v3893_v26  ;;  %2605 = vmatprep.subr.bf16.mxu0 %v2956_v36  ;;  %v1790_v41 = vrot.slane %v1781_v39, %v870_v33 }
 0x817   : > { %1725 = vadd.xlane.f32.xlu1 %v1722_v42 }
 0x818   : > { %2606 = vmatpush3.bf16.msra.mxu0 %v2957_v37 }
 0x819   : > { %2607 = vmatprep.subr.bf16.mxu0 %v2958_v38 }
 0x89c   : > { %v1724_v45 = vpop.xlane.xlu0 %1723 }
 0x89d   : > { %v1728_v46 = vmul.f32 0.0078125, %v1724_v45 }
 0x89f   : > { %v4022_v47 = vsub.f32 %v1721_v31, %v1728_v46  ;;  %v2959_v31 = vld [vmem:[%s3825_s2] sm:$0xff]  }
 0x8a0   : > { %v1726_v25 = vpop.xlane.xlu1 %1725  ;;  %2608 = vmatpush3.bf16.msra.mxu0 %v2959_v31 }
 0x8a1   : > { %v1729_v48 = vmul.f32 0.0078125, %v1726_v25  ;;  %v1732_v26 = vmul.f32 %v4022_v47, %v4022_v47 }
 0x8a3   : > { %v4026_v49 = vsub.f32 %v1722_v42, %v1729_v48  ;;  %1734 = vadd.xlane.f32.xlu0 %v1732_v26  ;;  %v1786_v42 = vrot.slane %v1781_v39, %v866_v40 }
 0x8a5   : > { %v1733_v50 = vmul.f32 %v4026_v49, %v4026_v49 }
 0x8a7   : > { %1736 = vadd.xlane.f32.xlu0 %v1733_v50 }
 0x92c   : > { %v1735_v13 = vpop.xlane.xlu0 %1734 }
 0x92d   : > { %v1738_v14 = vmul.f32 0.0078125, %v1735_v13 }
 0x92f   : > { %v1740_v15 = vadd.f32 1e-05, %v1738_v14 }
 0x930   : > { %v1737_v16 = vpop.xlane.xlu0 %1736 }
 0x931   : > { %2992 = vrsqrt.f32 %v1740_v15  ;;  %v1739_v17 = vmul.f32 0.0078125, %v1737_v16  ;;  %v2547_v15 = vld [vmem:[%s817_s19] ss:$0 sm:$0xff]  ;;  %s3411_s19 = smov [#allocation17]  }
 0x932   : > { %s3256_s17 = sshll.u32 %s3411_s19, 4  ;;  %s3257_s17 = int_to_ptr.vmem [resolvable:$false] %s3256_s17 }
 0x933   : > { %v1741_v18 = vadd.f32 1e-05, %v1739_v17  ;;  %v2548_v17 = vld [vmem:[%s712_s8] ss:$0 sm:$0xff]  ;;  %s2143_s8 = scalar_lea.sflag [#allocation4], %s3783_s4  ;;  %s3258_s30 = scalar_lea.vmem %s3257_s17, 512 }
 0x934   : > { %p3259_p1 = scmp.lt.s32.totalorder %s4091_s27, %s3257_s17  ;;  %p3260_p13 = scmp.lt.s32.totalorder %s3258_s30, %s3252_s6 }
 0x935   : > { %2994 = vrsqrt.f32 %v1741_v18 }
 0x936   : > { %p3261_p10 = por %p3260_p13, %p3259_p1 }
 0x938   : > { %p3262_p11 = pnand %p3261_p10, %p3255_p7 }
 0x93e   : > { %v2993_v5 = vpop.eup %2992 }
 0x93f   : > { %v1744_v19 = vmul.f32 %v2993_v5, %v4022_v47 }
 0x941   : > { %v1753_v23 = vmul.f32 %v2512_v20, %v1744_v19 }
 0x942   : > { %v2995_v21 = vpop.eup %2994 }
 0x943   : > { %v1745_v22 = vmul.f32 %v2995_v21, %v4026_v49  ;;  %v1762_v28 = vadd.f32 %v2513_v24, %v1753_v23 }
 0x945   : > { %v1754_v27 = vmul.f32 %v2512_v20, %v1745_v22 }
 0x947   : > { %v1763_v29 = vadd.f32 %v2513_v24, %v1754_v27 }
 0x949   : > { %v1764_v30 = vpack.c.bf16 %v1763_v29, %v1762_v28 }
 0x94b   : > { %1906 = vmatmul.mubr.bf16.vlgmr.msra.gmra.mxu1 %v1764_v30 }
 0xa0b   : > { %v1907_v57 = vpop.f32.mrf.mxu1 }
 0xa0c   : > { %v1908_v47 = vadd.f32 %v1907_v57, %v1786_v42 }
 0xa0d   : > { %v1909_v43 = vpop.f32.mrf.mxu1 }
 0xa0e   : > { %v1910_v45 = vadd.f32 %v1909_v43, %v1790_v41  ;;  %v1916_v51 = vmax.f32 %v1908_v47, 0.0 }
 0xa0f   : > { %v1911_v44 = vpop.f32.mrf.mxu1 }
 0xa10   : > { %v1912_v46 = vadd.f32 %v1911_v44, %v1786_v42  ;;  %v1917_v49 = vmax.f32 %v1910_v45, 0.0 }
 0xa11   : > { %v1913_v25 = vpop.f32.mrf.mxu1 }
 0xa12   : > { %v1914_v48 = vadd.f32 %v1913_v25, %v1790_v41  ;;  %v1918_v26 = vmax.f32 %v1912_v46, 0.0 }
 0xa14   : > { %v1919_v50 = vmax.f32 %v1914_v48, 0.0  ;;  %v1920_v53 = vpack.c.bf16 %v1918_v26, %v1916_v51 }
 0xa16   : > { %v1921_v52 = vpack.c.bf16 %v1919_v50, %v1917_v49 }
 0xa18   : > { %2089 = vmatprep.mubr.bf16.mxu0 %v1921_v52 }
 0xa19   : > { %2090 = vmatmul.mubr.bf16.vlgmr.msra.gmra.mxu0 %v1920_v53 }
 0xad9   : > { %v2609_v33 = vpop.f32.mrf.mxu0 }
 0xadb   : > { %v2610_v40 = vpop.f32.mrf.mxu0 }
 0xadc   : > { %v2611_v54 = vadd.f32 %v2610_v40, %v2609_v33 }
 0xadd   : > { %v2612_v55 = vpop.f32.mrf.mxu0 }
 0xade   : > { %v2092_v56 = vadd.f32 %v2611_v54, %v2530_v32 }
 0xadf   : > { %v2613_v58 = vpop.f32.mrf.mxu0 }
 0xae0   : > { %v2614_v59 = vadd.f32 %v2613_v58, %v2612_v55  ;;  %v2098_v4 = vadd.f32 %v2092_v56, %v1762_v28 }
 0xae2   : > { %v2095_v60 = vadd.f32 %v2614_v59, %v2530_v32  ;;  %2100 = vadd.xlane.f32.xlu0 %v2098_v4 }
 0xae4   : > { %v2099_v61 = vadd.f32 %v2095_v60, %v1763_v29 }
 0xae6   : > { %2102 = vadd.xlane.f32.xlu1 %v2099_v61 }
 0xb6b   : > { %v2101_v62 = vpop.xlane.xlu0 %2100 }
 0xb6c   : > { %v2104_v63 = vmul.f32 0.0078125, %v2101_v62 }
 0xb6e   : > { %v2106_v0 = vsub.f32 %v2098_v4, %v2104_v63 }
 0xb6f   : > { %v2103_v1 = vpop.xlane.xlu1 %2102 }
 0xb70   : > { %v2105_v2 = vmul.f32 0.0078125, %v2103_v1  ;;  %v2108_v3 = vmul.f32 %v2106_v0, %v2106_v0 }
 0xb72   : > { %v2107_v6 = vsub.f32 %v2099_v61, %v2105_v2  ;;  %2110 = vadd.xlane.f32.xlu0 %v2108_v3 }
 0xb74   : > { %v2109_v7 = vmul.f32 %v2107_v6, %v2107_v6 }
 0xb76   : > { %2112 = vadd.xlane.f32.xlu1 %v2109_v7 }
 0xbfb   : > { %v2111_v8 = vpop.xlane.xlu0 %2110 }
 0xbfc   : > { %v2114_v9 = vmul.f32 0.0078125, %v2111_v8 }
 0xbfe   : > { %v2116_v10 = vadd.f32 1e-05, %v2114_v9 }
 0xbff   : > { %v2113_v11 = vpop.xlane.xlu1 %2112 }
 0xc00   : > { %2996 = vrsqrt.f32 %v2116_v10  ;;  %v2115_v12 = vmul.f32 0.0078125, %v2113_v11 }
 0xc02   : > { %v2117_v13 = vadd.f32 1e-05, %v2115_v12 }
 0xc04   : > { %2998 = vrsqrt.f32 %v2117_v13 }
 0xc0d   : > { %v2997_v14 = vpop.eup %2996 }
 0xc0e   : > { %v2120_v16 = vmul.f32 %v2997_v14, %v2106_v0 }
 0xc10   : > { %v2129_v18 = vmul.f32 %v2547_v15, %v2120_v16 }
 0xc11   : > { %v2999_v5 = vpop.eup %2998 }
 0xc12   : > { %v2121_v19 = vmul.f32 %v2999_v5, %v2107_v6  ;;  %v2138_v20 = vadd.f32 %v2548_v17, %v2129_v18 }
 0xc14   : > { %v2130_v21 = vmul.f32 %v2547_v15, %v2121_v19  ;;  %2140 = vst [vmem:[%s3856_s21] sm:$0xff] %v2138_v20 }
 0xc16   : > { %v2139_v22 = vadd.f32 %v2548_v17, %v2130_v21 }
 0xc18   : > { %2141 = vst [vmem:[%s3856_s21 + $0x8] sm:$0xff] %v2139_v22 }
 0xc19   : > { %3265 = shalt.err (!%p3262_p11)
}
 0xc1a   : > { %s3266_s21 = scalar_lea.hbm %s4089_s25, 256  ;;  %s3270_s10 = scalar_lea.hbm %s4279_s0, 512 }
 0xc1b   : > { %p3267_p0 = scmp.ne.s32.totalorder %s4089_s25, %s3266_s21  ;;  %p3271_p6 = scmp.lt.s32.totalorder %s4089_s25, %s4279_s0 }
 0xc1c   : > { %p3272_p4 = scmp.lt.s32.totalorder %s3270_s10, %s3266_s21 }
 0xc1d   : > { %p3268_p9 = pnand %p3267_p0, %p4280_p8 }
 0xc1e   : > { %p3273_p2 = por %p3272_p4, %p3271_p6 }
 0xc1f   : > { %p3269_p5 = pneg %p3268_p9 }
 0xc21   : > { %p3274_p3 = pnand %p3273_p2, %p3269_p5 }
 0xc23   : > { %3277 = shalt.err (!%p3274_p3)
}
 0xc24   : > { %s3412_s3 = smov 128   ;;  %s3413_s2 = smov 8  }
 0xc25   : > { %2727 = dma.vmem_to_hbm [thread:$0]  (%p4280_p8), %s4091_s27, 256, %s4089_s25, %s2143_s8, %s3412_s3, %s3412_s3, %s3413_s2  }
 0xc26 PF: > { %s4281_s20 = sld [smem:[#allocation32_spill]] }
 0xc27   : > { %s4282_s24 = sld [smem:[#allocation27_spill]] }
 0xc28   : > { %s4283_s23 = sld [smem:[#allocation40_spill]] }
 0xc2c   : > { %p2762_p12 = scmp.ge.s32.totalorder %s4281_s20, 2 }
 0xc2d   : > { %s2171_s11 = sand.u32 1, %s4282_s24  }
 0xc2e   : > { %p4284_p7 = scmp.ne.s32.totalorder %s4283_s23, 0  ;;  %s2172_s22 = scalar_lea.sflag [#allocation4], %s2171_s11 }
 0xc30   : > { %p2758_p1 = pnand %p2762_p12, %p4284_p7 }
 0xc32   : > { %p2759_p13 = pneg %p2758_p1 }
 0xc34   : > { %3343 = dma.done.wait (%p2759_p13), %s2172_s22, 256  }
 0xc35   : > { %3345 = vsyncadd (%p2759_p13), %s2172_s22, 4294967040  ;;  %s41_s18 = sadd.s32 1, %s4281_s20   ;;  %s4285_s25 = sld [smem:[#allocation25_spill]] }
 0xc36   : > { %p38_p10 = scmp.ge.s32.totalorder %s41_s18, 10   ;;  %s4286_s26 = sld [smem:[#allocation26_spill]] }
 0xc37   : > { %s4287_s27 = sld [smem:[#allocation37_spill]]  ;;  %s4293_s28 = smov %s3364_s29 }
 0xc38   : > { %s4288_s4 = sld [smem:[#allocation28_spill]]  ;;  %s4295_s14 = smov %s3380_s16 }
 0xc39   : > { %s4289_s30 = sld [smem:[#allocation38_spill]] }
 0xc3a   : > { %s4290_s15 = sld [smem:[#allocation31_spill]] }
 0xc3b   : > { %s4291_s13 = sld [smem:[#allocation35_spill]] }
 0xc3c   : > { %s4292_s17 = sld [smem:[#allocation36_spill]] }
 0xc3d   :  { %40 = sbr.rel (!%p38_p10) target bundleno = 32 (0x20), region = 229 }
 0xc3e   : > { %s4294_s29 = smov %s4288_s4 }
 0xc41   : > { %s4296_s16 = smov %s4291_s13 }
 0xc42   :  { %2177 = vsyncpa [#allocation3], 1 }
 0xc43   :  { %2179 = vsyncpa [#allocation3 + $0x1], 1 }
 0xc44   :  { %2180 = vsyncpa [#allocation6], 1 }
 0xc45   :  { %2182 = vsyncpa [#allocation6 + $0x1], 1 }
 0xc46   :  { %2183 = vsyncpa [#allocation9], 1 }
 0xc47   :  { %2185 = vsyncpa [#allocation9 + $0x1], 1 }
 0xc48   :  { %2186 = vsyncpa [#allocation12], 1 }
 0xc49   :  { %2188 = vsyncpa [#allocation12 + $0x1], 1 }
 0xc4a   :  { %2189 = vsyncpa [#allocation15], 1 }
 0xc4b   :  { %2191 = vsyncpa [#allocation15 + $0x1], 1 }
 0xc4c   :  { %2192 = vsyncpa [#allocation4], 1 }
 0xc4d   :  { %2194 = vsyncpa [#allocation4 + $0x1], 1 }

</bundles_post_ra>
